<compile_context>
chip_gen: v5e
topology: v5e:2x2
jax: 0.10.0
libtpu: 0.0.40
codegen_flags: <defaults>
</compile_context>

<pallas_src>
import functools

import numpy as np
import jax
import jax.numpy as jnp
from jax import lax
from jax.experimental import pallas as pl
from jax.experimental.pallas import tpu as pltpu

C1, C2 = 16, 4   # conv1 / conv2 output channels (fixed by the nn.Module)
BLOCK_N = 4      # images per grid step


# ----------------------------------------------------------------------------
# Fused kernel (one grid step == BLOCK_N images)
# ----------------------------------------------------------------------------
def _autoencoder_kernel(xq_ref, wc1_ref, b1_ref, w2_ref, b2_ref,
                        wd1_ref, bd1_ref, wd2_ref, bd2_ref,
                        out_ref, p2x_ref, *, B, H, W):
    H2, W2 = H // 2, W // 2
    H4, W4 = H // 4, W // 4
    Wp = W + 2

    # --- conv1 (3x3 pad1, 1->16) + ReLU: one banded matmul.
    # xq rows hold PAIRS of padded-image rows (lane = pair_parity*Wp + x).
    # Kernel row (b, i) covers output rows y in {2i, 2i+1}; its K axis is the 4
    # padded rows {2i .. 2i+3} it needs, i.e. xq rows i and i+1 side by side.
    xq = xq_ref[...]                                            # (B, H2+1, 2*Wp)
    lhs1 = jnp.concatenate([xq[:, 0:H2, :], xq[:, 1:H2 + 1, :]], axis=2)
    lhs1 = lhs1.reshape(B * H2, 4 * Wp)                         # (B*H2, 4*Wp)
    a1 = jnp.dot(lhs1, wc1_ref[...], preferred_element_type=jnp.float32)
    a1 = jnp.maximum(a1 + b1_ref[...], 0.0)                     # (B*H2, 4*W2*C1)

    # --- maxpool1 2x2: max over the four contiguous (pool-y, pool-x) quarters.
    q = W2 * C1
    p1 = jnp.maximum(jnp.maximum(a1[:, 0 * q:1 * q], a1[:, 1 * q:2 * q]),
                     jnp.maximum(a1[:, 2 * q:3 * q], a1[:, 3 * q:4 * q]))
    # p1: (B*H2, W2*C1), rows = (b, i), lanes = (j, c)

    # --- conv2 (3x3 pad1, 16->4) + ReLU: one banded matmul over the 3
    # row-shifted, spatially padded p1 slabs concatenated along lanes.
    zc = jnp.zeros((B * H2, C1), jnp.float32)
    p1j = jnp.concatenate([zc, p1, zc], axis=1)                 # (B*H2, (W2+2)*C1)
    p1r = p1j.reshape(B, H2, (W2 + 2) * C1)
    zr = jnp.zeros((B, 1, (W2 + 2) * C1), jnp.float32)
    p1pad = jnp.concatenate([zr, p1r, zr], axis=1)              # (B, H2+2, (W2+2)*C1)
    lhs2 = jnp.concatenate(
        [p1pad[:, dy:dy + H2, :].reshape(B * H2, (W2 + 2) * C1)
         for dy in range(3)], axis=1)                           # (B*H2, 3*(W2+2)*C1)
    a2 = jnp.dot(lhs2, w2_ref[...], preferred_element_type=jnp.float32)
    a2 = jnp.maximum(a2 + b2_ref[...], 0.0)                     # (B*H2, 2*W4*C2)

    # --- maxpool2 2x2: contiguous lane-slab max over pool-x, then a strided
    # row-pair max (via a tiny VMEM scratch) over pool-y.  Output is compact:
    # only the H4*W4 valid pooled pixels survive.
    g = W4 * C2
    a2x = jnp.maximum(a2[:, :g], a2[:, g:])                     # (B*H2, W4*C2)
    p2x_ref[...] = a2x
    p2 = jnp.maximum(p2x_ref[pl.ds(0, B * H4, 2), :],
                     p2x_ref[pl.ds(1, B * H4, 2), :])           # (B*H4, W4*C2)
    # p2 rows = (b, i2), lanes = (j2, c2)

    # --- decoder: t_conv1 (2x2 s2, 4->16) + ReLU, t_conv2 (2x2 s2, 16->1) +
    # sigmoid.  kernel == stride => per-pixel matmuls; fused into exactly two
    # dots with block-diagonal packed weights (one block per j2 column group).
    z = jnp.dot(p2, wd1_ref[...], preferred_element_type=jnp.float32)
    z = jnp.maximum(z + bd1_ref[...], 0.0)                      # (B*H4, W4*4*C1)
    o = jnp.dot(z, wd2_ref[...], preferred_element_type=jnp.float32)
    o = o + bd2_ref[...]                                        # (B*H4, W4*16)
    # Exact sigmoid (approx reciprocal would loosen the 1e-4 tolerance).
    out_ref[...] = 1.0 / (1.0 + jnp.exp(-o))


# ----------------------------------------------------------------------------
# Static selection tensors (pure numpy, shapes only) for the banded weights
# ----------------------------------------------------------------------------
def _selectors(W, W2, W4):
    Sy1 = np.zeros((4, 3, 2), np.float32)            # [yy, dy, py] : yy == py+dy
    for py in range(2):
        for dy in range(3):
            Sy1[py + dy, dy, py] = 1.0
    Sx1 = np.zeros((W + 2, 3, 2, W2), np.float32)    # [xin, dx, px, j] : xin == 2j+px+dx
    for j in range(W2):
        for px in range(2):
            for dx in range(3):
                Sx1[2 * j + px + dx, dx, px, j] = 1.0
    Sx2 = np.zeros((W2 + 2, 3, 2, W4), np.float32)   # [jin, dx, px2, j2] : jin == 2j2+px2+dx
    for j2 in range(W4):
        for px2 in range(2):
            for dx in range(3):
                Sx2[2 * j2 + px2 + dx, dx, px2, j2] = 1.0
    return Sy1, Sx1, Sx2


def _pack_params(p, H, W):
    """Build banded / block-diagonal weight matrices (once per call, tiny)."""
    W2, W4 = W // 2, W // 4
    Sy1, Sx1, Sx2 = _selectors(W, W2, W4)
    f32 = jnp.float32

    # conv1: Wc1[(yy, xin), (py, px, j, c)] = w1[c,0, yy-py, xin-(2j+px)] (banded)
    w1t = jnp.transpose(p["w1"][:, 0], (1, 2, 0)).astype(f32)          # (dy, dx, c)
    Wc1 = jnp.einsum("ydp,xeqj,dec->yxpqjc", Sy1, Sx1, w1t)
    Wc1 = Wc1.reshape(4 * (W + 2), 4 * W2 * C1)                        # (72, 512)
    b1q = jnp.tile(p["b1"].astype(f32), 4 * W2).reshape(1, -1)         # (1, 512)

    # conv2: W2b[(dy, jin, cin), (px2, j2, cout)] = w2[cout,cin, dy, jin-(2j2+px2)]
    w2t = jnp.transpose(p["w2"], (2, 3, 1, 0)).astype(f32)             # (dy, dx, cin, cout)
    W2b = jnp.einsum("jdpq,ydco->yjcpqo", Sx2, w2t)
    W2b = W2b.reshape(3 * (W2 + 2) * C1, 2 * W4 * C2)                  # (480, 32)
    b2q = jnp.tile(p["b2"].astype(f32), 2 * W4).reshape(1, -1)         # (1, 32)

    # t_conv1: block-diagonal over j2; columns = (j2, t1=(dy1,dx1), cout)
    base1 = jnp.transpose(p["tw1"], (0, 2, 3, 1)).reshape(C2, 4 * C1).astype(f32)
    Wd1 = jnp.einsum("jk,ab->jakb", jnp.eye(W4, dtype=f32), base1)
    Wd1 = Wd1.reshape(W4 * C2, W4 * 4 * C1)                            # (16, 256)
    bd1 = jnp.tile(p["tb1"].astype(f32), 4 * W4).reshape(1, -1)        # (1, 256)

    # t_conv2: block-diagonal over (j2, t1); columns = (j2, t1, t2=(dy2,dx2))
    base2 = p["tw2"][:, 0].reshape(C1, 4).astype(f32)
    Wd2 = jnp.einsum("jk,ab->jakb", jnp.eye(W4 * 4, dtype=f32), base2)
    Wd2 = Wd2.reshape(W4 * 4 * C1, W4 * 16)                            # (256, 64)
    bd2 = jnp.full((1, W4 * 16), p["tb2"].astype(f32)[0])              # (1, 64)
    return Wc1, b1q, W2b, b2q, Wd1, bd1, Wd2, bd2


@jax.jit
def conv_autoencoder_forward(x_nchw, params):
    """Forward pass of ConvAutoencoder. Input/output layout: NCHW (PyTorch)."""
    x = x_nchw.astype(jnp.float32)
    N, Cin, H, W = x.shape
    assert Cin == 1 and H % 4 == 0 and W % 4 == 0
    H2, W2, H4, W4 = H // 2, W // 2, H // 4, W // 4

    B = min(BLOCK_N, N)
    Npad = -(-N // B) * B

    # Padded image, row-paired: (Npad, (H+2)/2, 2*(W+2)) -- same HBM bytes.
    xpad = jnp.pad(x[:, 0], ((0, Npad - N), (1, 1), (1, 1)))
    xq = xpad.reshape(Npad, (H + 2) // 2, 2 * (W + 2))

    Wc1, b1q, W2b, b2q, Wd1, bd1, Wd2, bd2 = _pack_params(params, H, W)

    kernel = functools.partial(_autoencoder_kernel, B=B, H=H, W=W)
    out2d = pl.pallas_call(
        kernel,
        out_shape=jax.ShapeDtypeStruct((Npad * H4, W4 * 16), jnp.float32),
        grid=(Npad // B,),
        in_specs=[
            pl.BlockSpec((B, (H + 2) // 2, 2 * (W + 2)), lambda n: (n, 0, 0)),
            pl.BlockSpec((4 * (W + 2), 4 * W2 * C1), lambda n: (0, 0)),
            pl.BlockSpec((1, 4 * W2 * C1), lambda n: (0, 0)),
            pl.BlockSpec((3 * (W2 + 2) * C1, 2 * W4 * C2), lambda n: (0, 0)),
            pl.BlockSpec((1, 2 * W4 * C2), lambda n: (0, 0)),
            pl.BlockSpec((W4 * C2, W4 * 4 * C1), lambda n: (0, 0)),
            pl.BlockSpec((1, W4 * 4 * C1), lambda n: (0, 0)),
            pl.BlockSpec((W4 * 4 * C1, W4 * 16), lambda n: (0, 0)),
            pl.BlockSpec((1, W4 * 16), lambda n: (0, 0)),
        ],
        out_specs=pl.BlockSpec((B * H4, W4 * 16), lambda n: (n, 0)),
        scratch_shapes=[pltpu.VMEM((B * H2, W4 * C2), jnp.float32)],
        compiler_params=pltpu.CompilerParams(
            dimension_semantics=("parallel",),
            vmem_limit_bytes=32 * 1024 * 1024),
    )(xq, Wc1, b1q, W2b, b2q, Wd1, bd1, Wd2, bd2)

    # Spatial interleave of the packed decoder output (layout plumbing only):
    # out2d[n*H4 + i2, j2*16 + (2*dy1+dx1)*4 + (2*dy2+dx2)] is output pixel
    # (4*i2 + 2*dy1 + dy2, 4*j2 + 2*dx1 + dx2).
    v = out2d[:N * H4].reshape(N, H4, W4, 2, 2, 2, 2)   # (n,i2,j2,dy1,dx1,dy2,dx2)
    v = v.transpose(0, 1, 3, 5, 2, 4, 6)                # (n,i2,dy1,dy2,j2,dx1,dx2)
    return v.reshape(N, 1, H, W)


# ----------------------------------------------------------------------------
# Pure-JAX reference (for correctness check)
# ----------------------------------------------------------------------------
def _ref_forward(x, p):
    def conv(x, w, b):
        y = lax.conv_general_dilated(x, w, (1, 1), ((1, 1), (1, 1)),
                                     dimension_numbers=("NCHW", "OIHW", "NCHW"))
        return y + b[None, :, None, None]

    def pool(x):
        return lax.reduce_window(x, -jnp.inf, lax.max,
                                 (1, 1, 2, 2), (1, 1, 2, 2), "VALID")

    def tconv(x, w, b):
        # kernel=2, stride=2 -> no overlap: pure block scatter.
        N, Ci, H, W = x.shape
        Co = w.shape[1]
        t = jnp.einsum("ncij,cokl->noikjl", x, w)        # (N,Co,H,2,W,2)
        y = t.reshape(N, Co, 2 * H, 2 * W)
        return y + b[None, :, None, None]

    h = jax.nn.relu(conv(x, p["w1"], p["b1"]))
    h = pool(h)
    h = jax.nn.relu(conv(h, p["w2"], p["b2"]))
    h = pool(h)
    h = jax.nn.relu(tconv(h, p["tw1"], p["tb1"]))
    h = jax.nn.sigmoid(tconv(h, p["tw2"], p["tb2"]))
    return h


# ----------------------------------------------------------------------------
# Main
# ----------------------------------------------------------------------------
if __name__ == "__main__":
    key = jax.random.PRNGKey(0)
    ks = jax.random.split(key, 9)

    # Deterministic synthetic parameters (shapes from the nn.Module __init__).
    params = {
        "w1": 0.1 * jax.random.normal(ks[0], (16, 1, 3, 3), jnp.float32),
        "b1": 0.1 * jax.random.normal(ks[1], (16,), jnp.float32),
        "w2": 0.1 * jax.random.normal(ks[2], (4, 16, 3, 3), jnp.float32),
        "b2": 0.1 * jax.random.normal(ks[3], (4,), jnp.float32),
        "tw1": 0.1 * jax.random.normal(ks[4], (4, 16, 2, 2), jnp.float32),
        "tb1": 0.1 * jax.random.normal(ks[5], (16,), jnp.float32),
        "tw2": 0.1 * jax.random.normal(ks[6], (16, 1, 2, 2), jnp.float32),
        "tb2": 0.1 * jax.random.normal(ks[7], (1,), jnp.float32),
    }

    # Small input consistent with the module (1 input channel, spatial % 4 == 0).
    x = jax.random.uniform(ks[8], (8, 1, 16, 16), jnp.float32)

    out = conv_autoencoder_forward(x, params)
    out = jax.block_until_ready(out)
    assert out.shape == (8, 1, 16, 16) and out.dtype == jnp.float32

    ref = _ref_forward(x, params)
    err = float(jnp.max(jnp.abs(out - ref)))
    assert err < 1e-4, f"max abs error vs reference: {err}"

    print("KERNEL_OK")
</pallas_src>

<mosaic_0001>
module attributes {stable_mosaic.version = 11 : i64} {
  func.func @_autoencoder_kernel(%arg0: i32, %arg1: memref<4x9x36xf32, #tpu.memory_space<vmem>>, %arg2: memref<72x512xf32, #tpu.memory_space<vmem>>, %arg3: memref<1x512xf32, #tpu.memory_space<vmem>>, %arg4: memref<480x32xf32, #tpu.memory_space<vmem>>, %arg5: memref<1x32xf32, #tpu.memory_space<vmem>>, %arg6: memref<16x256xf32, #tpu.memory_space<vmem>>, %arg7: memref<1x256xf32, #tpu.memory_space<vmem>>, %arg8: memref<256x64xf32, #tpu.memory_space<vmem>>, %arg9: memref<1x64xf32, #tpu.memory_space<vmem>>, %arg10: memref<16x64xf32, #tpu.memory_space<vmem>>, %arg11: memref<32x16xf32, #tpu.memory_space<vmem>>) attributes {dimension_semantics = [#tpu.dimension_semantics<parallel>], iteration_bounds = array<i64: 2>, scalar_prefetch = 0 : i64, scratch_operands = 1 : i64, tpu.core_type = #tpu.core_type<tc>, window_params = [{transform_indices = @transform_0, window_bounds = array<i64: 4, 9, 36>}, {pipeline_mode = #tpu.pipeline_mode<synchronous>, transform_indices = @transform_1, window_bounds = array<i64: 72, 512>}, {pipeline_mode = #tpu.pipeline_mode<synchronous>, transform_indices = @transform_2, window_bounds = array<i64: 1, 512>}, {pipeline_mode = #tpu.pipeline_mode<synchronous>, transform_indices = @transform_3, window_bounds = array<i64: 480, 32>}, {pipeline_mode = #tpu.pipeline_mode<synchronous>, transform_indices = @transform_4, window_bounds = array<i64: 1, 32>}, {pipeline_mode = #tpu.pipeline_mode<synchronous>, transform_indices = @transform_5, window_bounds = array<i64: 16, 256>}, {pipeline_mode = #tpu.pipeline_mode<synchronous>, transform_indices = @transform_6, window_bounds = array<i64: 1, 256>}, {pipeline_mode = #tpu.pipeline_mode<synchronous>, transform_indices = @transform_7, window_bounds = array<i64: 256, 64>}, {pipeline_mode = #tpu.pipeline_mode<synchronous>, transform_indices = @transform_8, window_bounds = array<i64: 1, 64>}, {transform_indices = @transform_9, window_bounds = array<i64: 16, 64>}]} {
    %c0 = arith.constant 0 : index
    %c0_0 = arith.constant 0 : index
    %c0_1 = arith.constant 0 : index
    %0 = vector.load %arg1[%c0, %c0_0, %c0_1] : memref<4x9x36xf32, #tpu.memory_space<vmem>>, vector<4x9x36xf32>
    %1 = vector.extract_strided_slice %0 {offsets = [0, 0, 0], sizes = [4, 8, 36], strides = [1, 1, 1]} : vector<4x9x36xf32> to vector<4x8x36xf32>
    %2 = vector.extract_strided_slice %0 {offsets = [0, 1, 0], sizes = [4, 8, 36], strides = [1, 1, 1]} : vector<4x9x36xf32> to vector<4x8x36xf32>
    %3 = tpu.concatenate %1, %2 in 2 : vector<4x8x36xf32>, vector<4x8x36xf32> -> vector<4x8x72xf32>
    %4 = vector.shape_cast %3 : vector<4x8x72xf32> to vector<32x72xf32>
    %c0_2 = arith.constant 0 : index
    %c0_3 = arith.constant 0 : index
    %5 = vector.load %arg2[%c0_2, %c0_3] : memref<72x512xf32, #tpu.memory_space<vmem>>, vector<72x512xf32>
    %cst = arith.constant dense<0.000000e+00> : vector<32x512xf32>
    %6 = tpu.matmul %4, %5, %cst {dimension_numbers = #tpu.dot_dimension_numbers<[1], [0], [0], [1], [0, 0, 1, 1], [], []>} : vector<32x72xf32>, vector<72x512xf32>, vector<32x512xf32> -> vector<32x512xf32>
    %c0_4 = arith.constant 0 : index
    %c0_5 = arith.constant 0 : index
    %7 = vector.load %arg3[%c0_4, %c0_5] : memref<1x512xf32, #tpu.memory_space<vmem>>, vector<1x512xf32>
    %8 = vector.broadcast %7 : vector<1x512xf32> to vector<32x512xf32>
    %9 = arith.addf %6, %8 : vector<32x512xf32>
    %cst_6 = arith.constant 0.000000e+00 : f32
    %10 = vector.broadcast %cst_6 : f32 to vector<32x512xf32>
    %11 = arith.maximumf %9, %10 : vector<32x512xf32>
    %12 = vector.extract_strided_slice %11 {offsets = [0, 0], sizes = [32, 128], strides = [1, 1]} : vector<32x512xf32> to vector<32x128xf32>
    %13 = vector.extract_strided_slice %11 {offsets = [0, 128], sizes = [32, 128], strides = [1, 1]} : vector<32x512xf32> to vector<32x128xf32>
    %14 = arith.maximumf %12, %13 : vector<32x128xf32>
    %15 = vector.extract_strided_slice %11 {offsets = [0, 256], sizes = [32, 128], strides = [1, 1]} : vector<32x512xf32> to vector<32x128xf32>
    %16 = vector.extract_strided_slice %11 {offsets = [0, 384], sizes = [32, 128], strides = [1, 1]} : vector<32x512xf32> to vector<32x128xf32>
    %17 = arith.maximumf %15, %16 : vector<32x128xf32>
    %18 = arith.maximumf %14, %17 : vector<32x128xf32>
    %cst_7 = arith.constant 0.000000e+00 : f32
    %19 = vector.broadcast %cst_7 : f32 to vector<32x16xf32>
    %20 = tpu.concatenate %19, %18, %19 in 1 : vector<32x16xf32>, vector<32x128xf32>, vector<32x16xf32> -> vector<32x160xf32>
    %21 = vector.shape_cast %20 : vector<32x160xf32> to vector<4x8x160xf32>
    %cst_8 = arith.constant 0.000000e+00 : f32
    %22 = vector.broadcast %cst_8 : f32 to vector<4x1x160xf32>
    %23 = tpu.concatenate %22, %21, %22 in 1 : vector<4x1x160xf32>, vector<4x8x160xf32>, vector<4x1x160xf32> -> vector<4x10x160xf32>
    %24 = vector.extract_strided_slice %23 {offsets = [0, 0, 0], sizes = [4, 8, 160], strides = [1, 1, 1]} : vector<4x10x160xf32> to vector<4x8x160xf32>
    %25 = vector.shape_cast %24 : vector<4x8x160xf32> to vector<32x160xf32>
    %26 = vector.extract_strided_slice %23 {offsets = [0, 1, 0], sizes = [4, 8, 160], strides = [1, 1, 1]} : vector<4x10x160xf32> to vector<4x8x160xf32>
    %27 = vector.shape_cast %26 : vector<4x8x160xf32> to vector<32x160xf32>
    %28 = vector.extract_strided_slice %23 {offsets = [0, 2, 0], sizes = [4, 8, 160], strides = [1, 1, 1]} : vector<4x10x160xf32> to vector<4x8x160xf32>
    %29 = vector.shape_cast %28 : vector<4x8x160xf32> to vector<32x160xf32>
    %30 = tpu.concatenate %25, %27, %29 in 1 : vector<32x160xf32>, vector<32x160xf32>, vector<32x160xf32> -> vector<32x480xf32>
    %c0_9 = arith.constant 0 : index
    %c0_10 = arith.constant 0 : index
    %31 = vector.load %arg4[%c0_9, %c0_10] : memref<480x32xf32, #tpu.memory_space<vmem>>, vector<480x32xf32>
    %cst_11 = arith.constant dense<0.000000e+00> : vector<32x32xf32>
    %32 = tpu.matmul %30, %31, %cst_11 {dimension_numbers = #tpu.dot_dimension_numbers<[1], [0], [0], [1], [0, 0, 1, 1], [], []>} : vector<32x480xf32>, vector<480x32xf32>, vector<32x32xf32> -> vector<32x32xf32>
    %c0_12 = arith.constant 0 : index
    %c0_13 = arith.constant 0 : index
    %33 = vector.load %arg5[%c0_12, %c0_13] : memref<1x32xf32, #tpu.memory_space<vmem>>, vector<1x32xf32>
    %34 = vector.broadcast %33 : vector<1x32xf32> to vector<32x32xf32>
    %35 = arith.addf %32, %34 : vector<32x32xf32>
    %cst_14 = arith.constant 0.000000e+00 : f32
    %36 = vector.broadcast %cst_14 : f32 to vector<32x32xf32>
    %37 = arith.maximumf %35, %36 : vector<32x32xf32>
    %38 = vector.extract_strided_slice %37 {offsets = [0, 0], sizes = [32, 16], strides = [1, 1]} : vector<32x32xf32> to vector<32x16xf32>
    %39 = vector.extract_strided_slice %37 {offsets = [0, 16], sizes = [32, 16], strides = [1, 1]} : vector<32x32xf32> to vector<32x16xf32>
    %40 = arith.maximumf %38, %39 : vector<32x16xf32>
    %c0_15 = arith.constant 0 : index
    %c0_16 = arith.constant 0 : index
    %41 = vector.load %arg11[%c0_15, %c0_16] : memref<32x16xf32, #tpu.memory_space<vmem>>, vector<32x16xf32>
    tpu.vector_store %arg11[%c0_15, %c0_16], %40 {strides = array<i32>} : memref<32x16xf32, #tpu.memory_space<vmem>>, vector<32x16xf32>,
    %c0_17 = arith.constant 0 : index
    %c0_18 = arith.constant 0 : index
    %42 = tpu.strided_load %arg11[%c0_17, %c0_18] {strides = array<i32: 2, 1>} : memref<32x16xf32, #tpu.memory_space<vmem>>, vector<16x16xf32>
    %c1 = arith.constant 1 : index
    %c0_19 = arith.constant 0 : index
    %43 = tpu.strided_load %arg11[%c1, %c0_19] {strides = array<i32: 2, 1>} : memref<32x16xf32, #tpu.memory_space<vmem>>, vector<16x16xf32>
    %44 = arith.maximumf %42, %43 : vector<16x16xf32>
    %c0_20 = arith.constant 0 : index
    %c0_21 = arith.constant 0 : index
    %45 = vector.load %arg6[%c0_20, %c0_21] : memref<16x256xf32, #tpu.memory_space<vmem>>, vector<16x256xf32>
    %cst_22 = arith.constant dense<0.000000e+00> : vector<16x256xf32>
    %46 = tpu.matmul %44, %45, %cst_22 {dimension_numbers = #tpu.dot_dimension_numbers<[1], [0], [0], [1], [0, 0, 1, 1], [], []>} : vector<16x16xf32>, vector<16x256xf32>, vector<16x256xf32> -> vector<16x256xf32>
    %c0_23 = arith.constant 0 : index
    %c0_24 = arith.constant 0 : index
    %47 = vector.load %arg7[%c0_23, %c0_24] : memref<1x256xf32, #tpu.memory_space<vmem>>, vector<1x256xf32>
    %48 = vector.broadcast %47 : vector<1x256xf32> to vector<16x256xf32>
    %49 = arith.addf %46, %48 : vector<16x256xf32>
    %cst_25 = arith.constant 0.000000e+00 : f32
    %50 = vector.broadcast %cst_25 : f32 to vector<16x256xf32>
    %51 = arith.maximumf %49, %50 : vector<16x256xf32>
    %c0_26 = arith.constant 0 : index
    %c0_27 = arith.constant 0 : index
    %52 = vector.load %arg8[%c0_26, %c0_27] : memref<256x64xf32, #tpu.memory_space<vmem>>, vector<256x64xf32>
    %cst_28 = arith.constant dense<0.000000e+00> : vector<16x64xf32>
    %53 = tpu.matmul %51, %52, %cst_28 {dimension_numbers = #tpu.dot_dimension_numbers<[1], [0], [0], [1], [0, 0, 1, 1], [], []>} : vector<16x256xf32>, vector<256x64xf32>, vector<16x64xf32> -> vector<16x64xf32>
    %c0_29 = arith.constant 0 : index
    %c0_30 = arith.constant 0 : index
    %54 = vector.load %arg9[%c0_29, %c0_30] : memref<1x64xf32, #tpu.memory_space<vmem>>, vector<1x64xf32>
    %55 = vector.broadcast %54 : vector<1x64xf32> to vector<16x64xf32>
    %56 = arith.addf %53, %55 : vector<16x64xf32>
    %cst_31 = arith.constant 0.000000e+00 : f32
    %57 = vector.broadcast %cst_31 : f32 to vector<16x64xf32>
    %58 = arith.subf %57, %56 : vector<16x64xf32>
    %59 = math.exp %58 : vector<16x64xf32>
    %cst_32 = arith.constant 1.000000e+00 : f32
    %60 = vector.broadcast %cst_32 : f32 to vector<16x64xf32>
    %61 = arith.addf %60, %59 : vector<16x64xf32>
    %cst_33 = arith.constant 1.000000e+00 : f32
    %62 = vector.broadcast %cst_33 : f32 to vector<16x64xf32>
    %63 = arith.divf %62, %61 : vector<16x64xf32>
    %c0_34 = arith.constant 0 : index
    %c0_35 = arith.constant 0 : index
    %64 = vector.load %arg10[%c0_34, %c0_35] : memref<16x64xf32, #tpu.memory_space<vmem>>, vector<16x64xf32>
    tpu.vector_store %arg10[%c0_34, %c0_35], %63 {strides = array<i32>} : memref<16x64xf32, #tpu.memory_space<vmem>>, vector<16x64xf32>,
    return
  }
  func.func @transform_0(%arg0: i32) -> (i32, i32, i32) {
    %c0_i32 = arith.constant 0 : i32
    %c0_i32_0 = arith.constant 0 : i32
    %c0_i32_1 = arith.constant 0 : i32
    return %arg0, %c0_i32, %c0_i32_0 : i32, i32, i32
  }
  func.func @transform_1(%arg0: i32) -> (i32, i32) {
    %c0_i32 = arith.constant 0 : i32
    %c0_i32_0 = arith.constant 0 : i32
    %c0_i32_1 = arith.constant 0 : i32
    return %c0_i32, %c0_i32_0 : i32, i32
  }
  func.func @transform_2(%arg0: i32) -> (i32, i32) {
    %c0_i32 = arith.constant 0 : i32
    %c0_i32_0 = arith.constant 0 : i32
    %c0_i32_1 = arith.constant 0 : i32
    return %c0_i32, %c0_i32_0 : i32, i32
  }
  func.func @transform_3(%arg0: i32) -> (i32, i32) {
    %c0_i32 = arith.constant 0 : i32
    %c0_i32_0 = arith.constant 0 : i32
    %c0_i32_1 = arith.constant 0 : i32
    return %c0_i32, %c0_i32_0 : i32, i32
  }
  func.func @transform_4(%arg0: i32) -> (i32, i32) {
    %c0_i32 = arith.constant 0 : i32
    %c0_i32_0 = arith.constant 0 : i32
    %c0_i32_1 = arith.constant 0 : i32
    return %c0_i32, %c0_i32_0 : i32, i32
  }
  func.func @transform_5(%arg0: i32) -> (i32, i32) {
    %c0_i32 = arith.constant 0 : i32
    %c0_i32_0 = arith.constant 0 : i32
    %c0_i32_1 = arith.constant 0 : i32
    return %c0_i32, %c0_i32_0 : i32, i32
  }
  func.func @transform_6(%arg0: i32) -> (i32, i32) {
    %c0_i32 = arith.constant 0 : i32
    %c0_i32_0 = arith.constant 0 : i32
    %c0_i32_1 = arith.constant 0 : i32
    return %c0_i32, %c0_i32_0 : i32, i32
  }
  func.func @transform_7(%arg0: i32) -> (i32, i32) {
    %c0_i32 = arith.constant 0 : i32
    %c0_i32_0 = arith.constant 0 : i32
    %c0_i32_1 = arith.constant 0 : i32
    return %c0_i32, %c0_i32_0 : i32, i32
  }
  func.func @transform_8(%arg0: i32) -> (i32, i32) {
    %c0_i32 = arith.constant 0 : i32
    %c0_i32_0 = arith.constant 0 : i32
    %c0_i32_1 = arith.constant 0 : i32
    return %c0_i32, %c0_i32_0 : i32, i32
  }
  func.func @transform_9(%arg0: i32) -> (i32, i32) {
    %c0_i32 = arith.constant 0 : i32
    %c0_i32_0 = arith.constant 0 : i32
    return %arg0, %c0_i32 : i32, i32
  }
}

</mosaic_0001>

<bundles_post_ra>
// kernel: tile.18
= control target key start
LH: loop header
LB: loop body
LE: loop exit
PB: predicated region body
PF: predicated region fallthrough
CT: control target
= control target key end

     0   :  { %s40_s0 = inlined_call_operand.vmem [shape: f32[16], index: 0, kind: input, shape index: {}]   ;;  %s41_s1 = inlined_call_operand.vmem [shape: f32[32,16], index: 1, kind: output, shape index: {}]  }
   0x1   :  { %v4_v0 = vld [vmem:[%s40_s0] ss:$0 sm:$0xff] }
   0x2   :  { %5 = vst [vmem:[%s41_s1] sm:$0xff] %v4_v0 }
   0x3   :  { %12 = vst [vmem:[%s41_s1 + $0x8] sm:$0xff] %v4_v0 }
   0x4   :  { %13 = vst [vmem:[%s41_s1 + $0x10] sm:$0xff] %v4_v0 }
   0x5   :  { %14 = vst [vmem:[%s41_s1 + $0x18] sm:$0xff] %v4_v0 }

// kernel: tile.19
= control target key start
LH: loop header
LB: loop body
LE: loop exit
PB: predicated region body
PF: predicated region fallthrough
CT: control target
= control target key end

     0   :  { %s88_s8 = smov 112   ;;  %s89_s11 = smov 80   ;;  %vm3_vm0 = vcmask 130048   ;;  %vm9_vm1 = vcmask 1048448   ;;  %vm15_vm2 = vcmask 917248   ;;  %vm21_vm3 = vcmask 786048   ;;  %s141_s0 = inlined_call_operand.vmem [shape: f32[32,16], index: 0, kind: input, shape index: {}]   ;;  %s142_s1 = inlined_call_operand.vmem [shape: f32[1,512], index: 1, kind: output, shape index: {}]  }
   0x1   :  { %v71_v0 = vld [vmem:[%s141_s0 + $0x7] ss:$8 sm:$0xf]   ;;  %v73_v1 = vld [vmem:[%s141_s0 + $0x5] ss:$8 sm:$0xf]  }
   0x2   :  { %7 = vrot.lane.b32.xlu0 %v71_v0, %s88_s8  ;;  %19 = vrot.lane.b32.xlu1 %v73_v1, %s89_s11  ;;  %v75_v2 = vld [vmem:[%s141_s0 + $0x3] ss:$8 sm:$0xf]   ;;  %s90_s14 = smov 48   ;;  %s91_s19 = smov 96   ;;  %vm27_vm4 = vcmask 654848  }
   0x3   :  { %31 = vrot.lane.b32.xlu2 %v75_v2, %s90_s14  ;;  %v72_v3 = vld [vmem:[%s141_s0 + $0x6] ss:$8 sm:$0xf]   ;;  %v74_v4 = vld [vmem:[%s141_s0 + $0x4] ss:$8 sm:$0xf]  }
   0x4   :  { %s92_s20 = smov 64   ;;  %v76_v5 = vld [vmem:[%s141_s0 + $0x2] ss:$8 sm:$0xf]   ;;  %s93_s23 = smov 32   ;;  %vm33_vm5 = vcmask 523648  }
   0x5   :  { %v77_v6 = vld [vmem:[%s141_s0 + $0x1] ss:$8 sm:$0xf]   ;;  %s94_s26 = smov 16   ;;  %vm39_vm6 = vcmask 392448   ;;  %vm45_vm7 = vcmask 261248  }
   0x6   :  { %v2_v7 = vld [vmem:[%s141_s0] ss:$8 sm:$0xf]  }
   0x7   :  { %4 = vst.msk [vmem:[#allocation0] ss:$8 sm:$0xf] %vm3_vm0, %v2_v7  }
   0xa   :  { %13 = vrot.lane.b32.xlu0 %v72_v3, %s91_s19  ;;  %25 = vrot.lane.b32.xlu1 %v74_v4, %s92_s20 }
   0xb   :  { %37 = vrot.lane.b32.xlu2 %v76_v5, %s93_s23 }
  0x12   :  { %43 = vrot.lane.b32.xlu0 %v77_v6, %s94_s26 }
  0x5d   :  { %v32_v8 = vpop.permute.xlu2 %31  }
  0x65   :  { %v38_v9 = vpop.permute.xlu2 %37  }
  0x74   :  { %v8_v10 = vpop.permute.xlu0 %7   ;;  %v20_v11 = vpop.permute.xlu1 %19  }
  0x75   :  { %10 = vst.msk [vmem:[#allocation0] ss:$8 sm:$0xf] %vm9_vm1, %v8_v10  }
  0x7c   :  { %v14_v12 = vpop.permute.xlu0 %13   ;;  %v26_v13 = vpop.permute.xlu1 %25  }
  0x7d   :  { %16 = vst.msk [vmem:[#allocation0] ss:$8 sm:$0xf] %vm15_vm2, %v14_v12  }
  0x7e   :  { %22 = vst.msk [vmem:[#allocation0] ss:$8 sm:$0xf] %vm21_vm3, %v20_v11  }
  0x7f   :  { %28 = vst.msk [vmem:[#allocation0] ss:$8 sm:$0xf] %vm27_vm4, %v26_v13  }
  0x80   :  { %34 = vst.msk [vmem:[#allocation0] ss:$8 sm:$0xf] %vm33_vm5, %v32_v8  }
  0x81   :  { %40 = vst.msk [vmem:[#allocation0] ss:$8 sm:$0xf] %vm39_vm6, %v38_v9  }
  0x84   :  { %v44_v14 = vpop.permute.xlu0 %43  }
  0x85   :  { %46 = vst.msk [vmem:[#allocation0] ss:$8 sm:$0xf] %vm45_vm7, %v44_v14  }
  0x8c   :  { %v49_v15 = vld [vmem:[#allocation0] sm:$0x1]  ;;  %v54_v16 = vld [vmem:[#allocation0 + $0x8] sm:$0x1]  ;;  %v60_v17 = vld [vmem:[#allocation0 + $0x10] sm:$0x1] }
  0x8d   :  { %52 = vst [vmem:[%s142_s1] sm:$0x1] %v49_v15  ;;  %v66_v18 = vld [vmem:[#allocation0 + $0x18] sm:$0x1] }
  0x8e   :  { %78 = vst [vmem:[%s142_s1 + $0x1] sm:$0x1] %v54_v16 }
  0x8f   :  { %79 = vst [vmem:[%s142_s1 + $0x2] sm:$0x1] %v60_v17 }
  0x90   :  { %80 = vst [vmem:[%s142_s1 + $0x3] sm:$0x1] %v66_v18 }

// kernel: tile.28
= control target key start
LH: loop header
LB: loop body
LE: loop exit
PB: predicated region body
PF: predicated region fallthrough
CT: control target
= control target key end

     0   :  { %s28_s0 = inlined_call_operand.vmem [shape: f32[16], index: 0, kind: input, shape index: {}]   ;;  %s29_s1 = inlined_call_operand.vmem [shape: f32[16,16], index: 1, kind: output, shape index: {}]  }
   0x1   :  { %v4_v0 = vld [vmem:[%s28_s0] ss:$0 sm:$0xff] }
   0x2   :  { %5 = vst [vmem:[%s29_s1] sm:$0xff] %v4_v0 }
   0x3   :  { %8 = vst [vmem:[%s29_s1 + $0x8] sm:$0xff] %v4_v0 }

// kernel: tile.29
= control target key start
LH: loop header
LB: loop body
LE: loop exit
PB: predicated region body
PF: predicated region fallthrough
CT: control target
= control target key end

     0   :  { %s7_s6 = smov 3  ;;  %s21_s9 = smov 3  ;;  %vm4_vm0 = vcmask 130048   ;;  %vm11_vm1 = vcmask 1048448   ;;  %vm18_vm2 = vcmask 917248   ;;  %vm25_vm3 = vcmask 786048   ;;  %s129_s0 = inlined_call_operand.vmem [shape: f32[16,16], index: 0, kind: input, shape index: {}]   ;;  %s130_s1 = inlined_call_operand.vmem [shape: f32[1,256], index: 1, kind: output, shape index: {}]  }
   0x1   :  { %v67_v0 = vld [vmem:[%s129_s0 + $0x7] ss:$8 sm:%s7_s6]   ;;  %s82_s10 = smov 112   ;;  %v69_v1 = vld [vmem:[%s129_s0 + $0x5] ss:$8 sm:%s21_s9]   ;;  %s83_s13 = smov 80  }
   0x2   :  { %9 = vrot.lane.b32.xlu0 %v67_v0, %s82_s10  ;;  %23 = vrot.lane.b32.xlu1 %v69_v1, %s83_s13  ;;  %s14_s14 = smov 3  ;;  %s28_s15 = smov 3  ;;  %vm32_vm4 = vcmask 654848   ;;  %vm39_vm5 = vcmask 523648   ;;  %vm46_vm6 = vcmask 392448   ;;  %vm53_vm7 = vcmask 261248  }
   0x3   :  { %s35_s16 = smov 3  ;;  %v68_v3 = vld [vmem:[%s129_s0 + $0x6] ss:$8 sm:%s14_s14]   ;;  %s84_s21 = smov 48   ;;  %v70_v4 = vld [vmem:[%s129_s0 + $0x4] ss:$8 sm:%s28_s15]  }
   0x4   :  { %v71_v2 = vld [vmem:[%s129_s0 + $0x3] ss:$8 sm:%s35_s16]   ;;  %s42_s24 = smov 3  ;;  %s85_s25 = smov 96  }
   0x5   :  { %37 = vrot.lane.b32.xlu2 %v71_v2, %s84_s21  ;;  %s86_s26 = smov 64   ;;  %s49_s27 = smov 3  ;;  %v72_v5 = vld [vmem:[%s129_s0 + $0x2] ss:$8 sm:%s42_s24]  }
   0x6   :  { %v73_v6 = vld [vmem:[%s129_s0 + $0x1] ss:$8 sm:%s49_s27]   ;;  %s87_s3 = smov 32   ;;  %s88_s4 = smov 16  }
   0x7   :  { %s2_s5 = smov 3 }
   0x8   :  { %v3_v7 = vld [vmem:[%s129_s0] ss:$8 sm:%s2_s5]  }
   0x9   :  { %5 = vst.msk [vmem:[#allocation0] ss:$8 sm:$0x3] %vm4_vm0, %v3_v7  }
   0xa   :  { %16 = vrot.lane.b32.xlu0 %v68_v3, %s85_s25  ;;  %30 = vrot.lane.b32.xlu1 %v70_v4, %s86_s26 }
   0xd   :  { %44 = vrot.lane.b32.xlu2 %v72_v5, %s87_s3 }
  0x12   :  { %51 = vrot.lane.b32.xlu0 %v73_v6, %s88_s4 }
  0x5f   :  { %v38_v8 = vpop.permute.xlu2 %37  }
  0x67   :  { %v45_v9 = vpop.permute.xlu2 %44  }
  0x74   :  { %v10_v10 = vpop.permute.xlu0 %9   ;;  %v24_v11 = vpop.permute.xlu1 %23  }
  0x75   :  { %12 = vst.msk [vmem:[#allocation0] ss:$8 sm:$0x3] %vm11_vm1, %v10_v10  }
  0x7c   :  { %v17_v12 = vpop.permute.xlu0 %16   ;;  %v31_v13 = vpop.permute.xlu1 %30  }
  0x7d   :  { %19 = vst.msk [vmem:[#allocation0] ss:$8 sm:$0x3] %vm18_vm2, %v17_v12  }
  0x7e   :  { %26 = vst.msk [vmem:[#allocation0] ss:$8 sm:$0x3] %vm25_vm3, %v24_v11  }
  0x7f   :  { %33 = vst.msk [vmem:[#allocation0] ss:$8 sm:$0x3] %vm32_vm4, %v31_v13  }
  0x80   :  { %40 = vst.msk [vmem:[#allocation0] ss:$8 sm:$0x3] %vm39_vm5, %v38_v8  }
  0x81   :  { %47 = vst.msk [vmem:[#allocation0] ss:$8 sm:$0x3] %vm46_vm6, %v45_v9  }
  0x84   :  { %v52_v14 = vpop.permute.xlu0 %51  }
  0x85   :  { %54 = vst.msk [vmem:[#allocation0] ss:$8 sm:$0x3] %vm53_vm7, %v52_v14  }
  0x8c   :  { %v57_v15 = vld [vmem:[#allocation0] sm:$0x1]  ;;  %v62_v16 = vld [vmem:[#allocation0 + $0x8] sm:$0x1] }
  0x8d   :  { %60 = vst [vmem:[%s130_s1] sm:$0x1] %v57_v15 }
  0x8e   :  { %74 = vst [vmem:[%s130_s1 + $0x1] sm:$0x1] %v62_v16 }

// kernel: tile.23
= control target key start
LH: loop header
LB: loop body
LE: loop exit
PB: predicated region body
PF: predicated region fallthrough
CT: control target
= control target key end

     0   :  { %s22_s0 = inlined_call_operand.vmem [shape: f32[4], index: 0, kind: input, shape index: {}]   ;;  %s23_s1 = inlined_call_operand.vmem [shape: f32[8,4], index: 1, kind: output, shape index: {}]  }
   0x1   :  { %v4_v0 = vld [vmem:[%s22_s0] ss:$0 sm:$0xff] }
   0x2   :  { %5 = vst [vmem:[%s23_s1] sm:$0xff] %v4_v0 }

// kernel: tile.24
= control target key start
LH: loop header
LB: loop body
LE: loop exit
PB: predicated region body
PF: predicated region fallthrough
CT: control target
= control target key end

     0   :  { %s67_s10 = smov 28   ;;  %s68_s11 = smov 20   ;;  %vm3_vm0 = vcmask 31744   ;;  %vm9_vm1 = vcmask 261344   ;;  %vm15_vm2 = vcmask 228544   ;;  %vm21_vm3 = vcmask 195744   ;;  %s111_s0 = inlined_call_operand.vmem [shape: f32[8,4], index: 0, kind: input, shape index: {}]   ;;  %s112_s1 = inlined_call_operand.vmem [shape: f32[1,32], index: 1, kind: output, shape index: {}]  }
   0x1   :  { %v53_v0 = vld [vmem:[%s111_s0 + $0x7] sm:$0x1]   ;;  %v55_v1 = vld [vmem:[%s111_s0 + $0x5] sm:$0x1]   ;;  %v57_v2 = vld [vmem:[%s111_s0 + $0x3] sm:$0x1]  }
   0x2   :  { %7 = vrot.lane.b32.xlu0 %v53_v0, %s67_s10  ;;  %19 = vrot.lane.b32.xlu1 %v55_v1, %s68_s11  ;;  %s69_s14 = smov 12   ;;  %v54_v3 = vld [vmem:[%s111_s0 + $0x6] sm:$0x1]   ;;  %v56_v4 = vld [vmem:[%s111_s0 + $0x4] sm:$0x1]   ;;  %s70_s21 = smov 24  }
   0x3   :  { %31 = vrot.lane.b32.xlu2 %v57_v2, %s69_s14  ;;  %v58_v5 = vld [vmem:[%s111_s0 + $0x2] sm:$0x1]   ;;  %s71_s22 = smov 16   ;;  %s72_s23 = smov 8   ;;  %v59_v6 = vld [vmem:[%s111_s0 + $0x1] sm:$0x1]  }
   0x4   :  { %s73_s26 = smov 4   ;;  %v2_v7 = vld [vmem:[%s111_s0] sm:$0x1]   ;;  %vm27_vm4 = vcmask 162944   ;;  %vm33_vm5 = vcmask 130144   ;;  %vm39_vm6 = vcmask 97344  }
   0x5   :  { %4 = vst.msk [vmem:[#allocation0] sm:$0x1] %vm3_vm0, %v2_v7   ;;  %vm45_vm7 = vcmask 64544  }
   0xa   :  { %13 = vrot.lane.b32.xlu0 %v54_v3, %s70_s21  ;;  %25 = vrot.lane.b32.xlu1 %v56_v4, %s71_s22 }
   0xb   :  { %37 = vrot.lane.b32.xlu2 %v58_v5, %s72_s23 }
  0x12   :  { %43 = vrot.lane.b32.xlu0 %v59_v6, %s73_s26 }
  0x5d   :  { %v32_v8 = vpop.permute.xlu2 %31  }
  0x65   :  { %v38_v9 = vpop.permute.xlu2 %37  }
  0x74   :  { %v8_v10 = vpop.permute.xlu0 %7   ;;  %v20_v11 = vpop.permute.xlu1 %19  }
  0x75   :  { %10 = vst.msk [vmem:[#allocation0] sm:$0x1] %vm9_vm1, %v8_v10  }
  0x7c   :  { %v14_v12 = vpop.permute.xlu0 %13   ;;  %v26_v13 = vpop.permute.xlu1 %25  }
  0x7d   :  { %16 = vst.msk [vmem:[#allocation0] sm:$0x1] %vm15_vm2, %v14_v12  }
  0x7e   :  { %22 = vst.msk [vmem:[#allocation0] sm:$0x1] %vm21_vm3, %v20_v11  }
  0x7f   :  { %28 = vst.msk [vmem:[#allocation0] sm:$0x1] %vm27_vm4, %v26_v13  }
  0x80   :  { %34 = vst.msk [vmem:[#allocation0] sm:$0x1] %vm33_vm5, %v32_v8  }
  0x81   :  { %40 = vst.msk [vmem:[#allocation0] sm:$0x1] %vm39_vm6, %v38_v9  }
  0x84   :  { %v44_v14 = vpop.permute.xlu0 %43  }
  0x85   :  { %46 = vst.msk [vmem:[#allocation0] sm:$0x1] %vm45_vm7, %v44_v14  }
  0x8c   :  { %v49_v15 = vld [vmem:[#allocation0] sm:$0x1] }
  0x8d   :  { %52 = vst [vmem:[%s112_s1] sm:$0x1] %v49_v15 }

// kernel: conv_autoencoder_forward.1
= control target key start
LH: loop header
LB: loop body
LE: loop exit
PB: predicated region body
PF: predicated region fallthrough
CT: control target
= control target key end

     0   :  { %s1402_s30 = smov 0   ;;  %s2039_s0 = inlined_call_operand.vmem [shape: f32[8,9,36], index: 0, kind: input, shape index: {}]   ;;  %s2040_s1 = inlined_call_operand.vmem [shape: f32[72,512], index: 1, kind: input, shape index: {}]   ;;  %s2041_s2 = inlined_call_operand.vmem [shape: f32[1,512], index: 2, kind: input, shape index: {}]   ;;  %s2042_s3 = inlined_call_operand.vmem [shape: f32[480,32], index: 3, kind: input, shape index: {}]   ;;  %s2043_s4 = inlined_call_operand.vmem [shape: f32[1,32], index: 4, kind: input, shape index: {}]   ;;  %s2044_s5 = inlined_call_operand.vmem [shape: f32[16,256], index: 5, kind: input, shape index: {}]   ;;  %s2045_s6 = inlined_call_operand.vmem [shape: f32[1,256], index: 6, kind: input, shape index: {}]   ;;  %s2046_s7 = inlined_call_operand.vmem [shape: f32[256,64], index: 7, kind: input, shape index: {}]   ;;  %s2047_s8 = inlined_call_operand.vmem [shape: f32[1,64], index: 8, kind: input, shape index: {}]   ;;  %s2048_s9 = inlined_call_operand.vmem [shape: f32[32,64], index: 9, kind: output, shape index: {}]  }
   0x1 LB: > { %s1251_s10 = sadd.s32 4294967295, %s1345_s30   ;;  %p1255_p0 = scmp.ge.s32.totalorder %s1345_s30, 1  ;;  %s1345_s30 = sphi %s1402_s30, %s19_s30  }
   0x2   : > { %p289_p1 = scmp.lt.s32.totalorder %s1345_s30, 3 }
   0x4   : > { %p290_p2 = pnand %p1255_p0, %p289_p1 }
   0x5   : > { %s1256_s11 = sshll.u32 (!%p290_p2), %s1251_s10, 2  ;;  %s1347_s27 = smov (!%p290_p2), 36  }
   0x6   : > { %293 = sbr.rel (%p290_p2) target bundleno = 1096 (0x448), region = 56  ;;  %p327_p3 = scmp.lt.s32.totalorder (!%p290_p2), %s1256_s11, 7 }
   0x7   : > { %s1348_s26 = smov (!%p290_p2), 16   ;;  %s1350_s14 = smov (!%p290_p2), 32  }
   0x8   : > { %s1351_s13 = smov (!%p290_p2), 112   ;;  %s1259_s15 = sshll.u32 (!%p290_p2), %s1251_s10, 1 }
   0x9   : > { %p334_p4 = scmp.lt.s32.totalorder (!%p290_p2), %s1259_s15, 3 }
   0xb   : > { %v417_v0 = vld [vmem:[%s2040_s1 + $0x100] sm:$0xff]  ;;  %v418_v1 = vld [vmem:[%s2040_s1 + $0x108] sm:$0xff]  ;;  %v419_v2 = vld [vmem:[%s2040_s1 + $0x110] sm:$0xff]  ;;  %s2052_s11 = smov (!%p327_p3, %s1256_s11), 7  ;;  %vm355_vm0 = vcmask 1046528   ;;  %vm380_vm1 = vcmask 293888  }
   0xc   : > { %451 = vmatpush.msra.mxu0 %v417_v0  ;;  %480 = vmatpush.msra.mxu1 %v418_v1  ;;  %v420_v3 = vld [vmem:[%s2040_s1 + $0x118] sm:$0xff]  ;;  %v413_v4 = vld [vmem:[%s2040_s1 + $0xe0] sm:$0xff]  ;;  %v414_v5 = vld [vmem:[%s2040_s1 + $0xe8] sm:$0xff]  ;;  %s1295_s22 = sshll.u32 %s2052_s11, 4  ;;  %vm431_vm2 = vcmask 588800   ;;  %vm604_vm3 = vcmask 130048  }
   0xd   : > { %509 = vmatpush.msra.mxu2 %v419_v2  ;;  %538 = vmatpush.msra.mxu3 %v420_v3  ;;  %v415_v6 = vld [vmem:[%s2040_s1 + $0xf0] sm:$0xff]  ;;  %v416_v7 = vld [vmem:[%s2040_s1 + $0xf8] sm:$0xff]  ;;  %v409_v8 = vld [vmem:[%s2040_s1 + $0xc0] sm:$0xff]  ;;  %s1463_s29 = scalar_lea.vmem %s2039_s0, %s1295_s22  ;;  %vm637_vm4 = vcmask 1040384   ;;  %vm694_vm6 = vcmask 1045504   ;;  %vm735_vm7 = vcmask 261120  }
   0xe   : > { %452 = vmatpush.msra.mxu0 %v413_v4  ;;  %481 = vmatpush.msra.mxu1 %v414_v5  ;;  %v410_v9 = vld [vmem:[%s2040_s1 + $0xc8] sm:$0xff]  ;;  %v411_v10 = vld [vmem:[%s2040_s1 + $0xd0] sm:$0xff]  ;;  %v412_v11 = vld [vmem:[%s2040_s1 + $0xd8] sm:$0xff]  ;;  %vm764_vm8 = vcmask 523264   ;;  %vm845_vm9 = vcmask 785408   ;;  %s2054_s15 = smov (!%p334_p4, %s1259_s15), 3 }
   0xf   : > { %510 = vmatpush.msra.mxu2 %v415_v6  ;;  %539 = vmatpush.msra.mxu3 %v416_v7  ;;  %v405_v12 = vld [vmem:[%s2040_s1 + $0xa0] sm:$0xff]  ;;  %v406_v13 = vld [vmem:[%s2040_s1 + $0xa8] sm:$0xff]  ;;  %v407_v14 = vld [vmem:[%s2040_s1 + $0xb0] sm:$0xff] }
  0x10   : > { %453 = vmatpush.msra.mxu0 %v409_v8  ;;  %482 = vmatpush.msra.mxu1 %v410_v9  ;;  %v408_v15 = vld [vmem:[%s2040_s1 + $0xb8] sm:$0xff]  ;;  %v401_v16 = vld [vmem:[%s2040_s1 + $0x80] sm:$0xff]  ;;  %v402_v17 = vld [vmem:[%s2040_s1 + $0x88] sm:$0xff] }
  0x11   : > { %511 = vmatpush.msra.mxu2 %v411_v10  ;;  %540 = vmatpush.msra.mxu3 %v412_v11  ;;  %v403_v18 = vld [vmem:[%s2040_s1 + $0x90] sm:$0xff]  ;;  %v1475_v19 = vld [vmem:[%s1463_s29] sm:$0xff]  ;;  %v340_v20 = vld [vmem:[%s1463_s29 + $0x8] sm:$0x1] }
  0x12   : > { %454 = vmatpush.msra.mxu0 %v405_v12  ;;  %483 = vmatpush.msra.mxu1 %v406_v13  ;;  %v404_v21 = vld [vmem:[%s2040_s1 + $0x98] sm:$0xff]  ;;  %v356_v22 = vrot.slane %v1475_v19, 1  ;;  %v357_v23 = vrot.slane %v340_v20, 1  ;;  %v1483_v24 = vld [vmem:[%s1463_s29 + $0x10] sm:$0xff]  ;;  %v1486_v25 = vld [vmem:[%s1463_s29 + $0x20] sm:$0xff] }
  0x13   : > { %512 = vmatpush.msra.mxu2 %v407_v14  ;;  %541 = vmatpush.msra.mxu3 %v408_v15  ;;  %v397_v26 = vld [vmem:[%s2040_s1 + $0x60] sm:$0xff]  ;;  %v342_v27 = vld [vmem:[%s1463_s29 + $0x18] sm:$0x1]  ;;  %v344_v28 = vld [vmem:[%s1463_s29 + $0x28] sm:$0x1]  ;;  %v362_v29 = vrot.slane %v1486_v25, 1 }
  0x14   : > { %455 = vmatpush.msra.mxu0 %v401_v16  ;;  %484 = vmatpush.msra.mxu1 %v402_v17  ;;  %v398_v30 = vld [vmem:[%s2040_s1 + $0x68] sm:$0xff]  ;;  %v358_v31 = vsel %vm355_vm0, %v356_v22, %v357_v23  ;;  %v363_v32 = vrot.slane %v344_v28, 1  ;;  %v1499_v33 = vld [vmem:[%s1463_s29 + $0x30] sm:$0xff]  ;;  %v400_v35 = vld [vmem:[%s2040_s1 + $0x78] sm:$0xff]  ;;  %v359_v39 = vrot.slane %v1483_v24, 1  ;;  %v360_v40 = vrot.slane %v342_v27, 1 }
  0x15   : > { %513 = vmatpush.msra.mxu2 %v403_v18  ;;  %542 = vmatpush.msra.mxu3 %v404_v21  ;;  %v399_v34 = vld [vmem:[%s2040_s1 + $0x70] sm:$0xff]  ;;  %v346_v36 = vld [vmem:[%s1463_s29 + $0x38] sm:$0x1]  ;;  %v393_v37 = vld [vmem:[%s2040_s1 + $0x40] sm:$0xff]  ;;  %v365_v46 = vrot.slane %v1499_v33, 1 }
  0x16   : > { %368 = vrot.lane.b32.xlu0 %v358_v31, %s1347_s27  ;;  %456 = vmatpush.msra.mxu0 %v397_v26  ;;  %v394_v38 = vld [vmem:[%s2040_s1 + $0x48] sm:$0xff]  ;;  %v364_v41 = vsel %vm355_vm0, %v362_v29, %v363_v32  ;;  %v395_v42 = vld [vmem:[%s2040_s1 + $0x50] sm:$0xff]  ;;  %v396_v43 = vld [vmem:[%s2040_s1 + $0x58] sm:$0xff]  ;;  %v366_v47 = vrot.slane %v346_v36, 1  ;;  %v361_v50 = vsel %vm355_vm0, %v359_v39, %v360_v40 }
  0x17   : > { %485 = vmatpush.msra.mxu1 %v398_v30  ;;  %514 = vmatpush.msra.mxu2 %v399_v34  ;;  %v389_v44 = vld [vmem:[%s2040_s1 + $0x20] sm:$0xff]  ;;  %v390_v45 = vld [vmem:[%s2040_s1 + $0x28] sm:$0xff]  ;;  %v391_v48 = vld [vmem:[%s2040_s1 + $0x30] sm:$0xff] }
  0x18   : > { %372 = vrot.lane.b32.xlu1 %v364_v41, %s1347_s27  ;;  %543 = vmatpush.msra.mxu3 %v400_v35  ;;  %v392_v49 = vld [vmem:[%s2040_s1 + $0x38] sm:$0xff]  ;;  %v367_v51 = vsel %vm355_vm0, %v365_v46, %v366_v47  ;;  %v385_v52 = vld [vmem:[%s2040_s1] sm:$0xff]  ;;  %v386_v53 = vld [vmem:[%s2040_s1 + $0x8] sm:$0xff] }
  0x19   : > { %457 = vmatpush.msra.mxu0 %v393_v37  ;;  %486 = vmatpush.msra.mxu1 %v394_v38  ;;  %v387_v54 = vld [vmem:[%s2040_s1 + $0x10] sm:$0xff]  ;;  %v388_v55 = vld [vmem:[%s2040_s1 + $0x18] sm:$0xff]  ;;  %v421_v0 = vld [vmem:[%s2041_s2] sm:$0xf] }
  0x1a   : > { %515 = vmatpush.msra.mxu2 %v395_v42  ;;  %544 = vmatpush.msra.mxu3 %v396_v43  ;;  %v1580_v1 = vperm.slane %v421_v0, 0  ;;  %v1582_v3 = vperm.slane %v421_v0, 1  ;;  %v1586_v7 = vperm.slane %v421_v0, 2  ;;  %v1588_v8 = vperm.slane %v421_v0, 3  ;;  %v796_v17 = vld [vmem:[%s2042_s3 + $0x78] sm:$0xff]  ;;  %v795_v18 = vld [vmem:[%s2042_s3 + $0x70] sm:$0xff]  ;;  %vm1659_vm5 = vmneg %vm637_vm4 }
  0x1b   : > { %458 = vmatpush.msra.mxu0 %v389_v44  ;;  %487 = vmatpush.msra.mxu1 %v390_v45  ;;  %v794_v21 = vld [vmem:[%s2042_s3 + $0x68] sm:$0xff]  ;;  %v793_v26 = vld [vmem:[%s2042_s3 + $0x60] sm:$0xff]  ;;  %v792_v28 = vld [vmem:[%s2042_s3 + $0x58] sm:$0xff] }
  0x1c   : > { %516 = vmatpush.msra.mxu2 %v391_v48  ;;  %545 = vmatpush.msra.mxu3 %v392_v49  ;;  %v791_v37 = vld [vmem:[%s2042_s3 + $0x50] sm:$0xff]  ;;  %v790_v40 = vld [vmem:[%s2042_s3 + $0x48] sm:$0xff]  ;;  %v789_v45 = vld [vmem:[%s2042_s3 + $0x40] sm:$0xff] }
  0x1d   : > { %459 = vmatpush.msra.mxu0 %v385_v52  ;;  %488 = vmatpush.msra.mxu1 %v386_v53  ;;  %v788_v47 = vld [vmem:[%s2042_s3 + $0x38] sm:$0xff]  ;;  %v785_v0 = vld [vmem:[%s2042_s3 + $0x20] sm:$0xff] }
  0x1e   : > { %370 = vrot.lane.b32.xlu0 %v361_v50, %s1347_s27  ;;  %517 = vmatpush.msra.mxu2 %v387_v54 }
  0x1f   : > { %546 = vmatpush.msra.mxu3 %v388_v55  ;;  %854 = vmatpush.msrb.mxu0 %v796_v17 }
  0x20   : > { %374 = vrot.lane.b32.xlu1 %v367_v51, %s1347_s27  ;;  %s1260_s27 = sshll.u32 %s2054_s15, 3 }
  0x21   : > { %855 = vmatpush.msrb.mxu0 %v795_v18  ;;  %s2030_s17 = scalar_lea.vmem %s2048_s9, %s1260_s27 }
  0x23   : > { %856 = vmatpush.msrb.mxu0 %v794_v21 }
  0x25   : > { %857 = vmatpush.msrb.mxu0 %v793_v26 }
  0x27   : > { %858 = vmatpush.msrb.mxu0 %v792_v28 }
  0x29   : > { %859 = vmatpush.msrb.mxu0 %v791_v37 }
  0x2b   : > { %860 = vmatpush.msrb.mxu0 %v790_v40 }
  0x2d   : > { %861 = vmatpush.msrb.mxu0 %v789_v45 }
  0x2f   : > { %862 = vmatpush.msrb.mxu0 %v788_v47 }
  0x88   : > { %v369_v56 = vpop.permute.xlu0 %368 }
  0x89   : > { %v381_v57 = vsel %vm380_vm1, %v1475_v19, %v369_v56  ;;  %v787_v56 = vld [vmem:[%s2042_s3 + $0x30] sm:$0xff] }
  0x8a   : > { %1261 = vmatmul.msk.f32.vlgmr.msra.gmra.mxu0 %vm431_vm2, %v381_v57  ;;  %1265 = vmatmul.msk.f32.vlgmr.msra.gmra.mxu1 %vm431_vm2, %v381_v57  ;;  %v373_v60 = vpop.permute.xlu1 %372 }
  0x8b   : > { %1269 = vmatmul.msk.f32.vlgmr.msra.gmra.mxu2 %vm431_vm2, %v381_v57  ;;  %1273 = vmatmul.msk.f32.vlgmr.msra.gmra.mxu3 %vm431_vm2, %v381_v57  ;;  %v383_v61 = vsel %vm380_vm1, %v1486_v25, %v373_v60 }
  0x8c   : > { %863 = vmatpush.msrb.mxu0 %v787_v56 }
  0x90   : > { %v371_v58 = vpop.permute.xlu0 %370 }
  0x91   : > { %v382_v59 = vsel %vm380_vm1, %v1483_v24, %v371_v58 }
  0x92   : > { %1262 = vmatmul.msk.f32.gmra.mxu0 %vm431_vm2, %v382_v59  ;;  %1266 = vmatmul.msk.f32.gmra.mxu1 %vm431_vm2, %v382_v59  ;;  %v375_v62 = vpop.permute.xlu1 %374 }
  0x93   : > { %1270 = vmatmul.msk.f32.gmra.mxu2 %vm431_vm2, %v382_v59  ;;  %1274 = vmatmul.msk.f32.gmra.mxu3 %vm431_vm2, %v382_v59  ;;  %v384_v63 = vsel %vm380_vm1, %v1499_v33, %v375_v62 }
  0x9a   : > { %1263 = vmatmul.msk.f32.gmra.mxu0 %vm431_vm2, %v383_v61  ;;  %1267 = vmatmul.msk.f32.gmra.mxu1 %vm431_vm2, %v383_v61 }
  0x9b   : > { %1271 = vmatmul.msk.f32.gmra.mxu2 %vm431_vm2, %v383_v61  ;;  %1275 = vmatmul.msk.f32.gmra.mxu3 %vm431_vm2, %v383_v61  ;;  %v786_v61 = vld [vmem:[%s2042_s3 + $0x28] sm:$0xff] }
  0x9c   : > { %864 = vmatpush.msrb.mxu0 %v786_v61 }
  0x9e   : > { %865 = vmatpush.msrb.mxu0 %v785_v0  ;;  %v810_v0 = vld [vmem:[%s2042_s3 + $0xe8] sm:$0xff] }
  0xa2   : > { %1264 = vmatmul.msk.f32.gmra.mxu0 %vm431_vm2, %v384_v63  ;;  %1268 = vmatmul.msk.f32.gmra.mxu1 %vm431_vm2, %v384_v63 }
  0xa3   : > { %1272 = vmatmul.msk.f32.gmra.mxu2 %vm431_vm2, %v384_v63  ;;  %1276 = vmatmul.msk.f32.gmra.mxu3 %vm431_vm2, %v384_v63 }
 0x107   : > { %v461_v2 = vpop.f32.mrf.mxu0  ;;  %v490_v4 = vpop.f32.mrf.mxu1 }
 0x108   : > { %v462_v5 = vadd.f32 %v461_v2, %v1580_v1  ;;  %v491_v6 = vadd.f32 %v490_v4, %v1582_v3 }
 0x10a   : > { %v560_v11 = vmax.f32 %v462_v5, 0.0  ;;  %v561_v12 = vmax.f32 %v491_v6, 0.0 }
 0x10c   : > { %v576_v22 = vmax.f32 %v560_v11, %v561_v12  ;;  %v783_v11 = vld [vmem:[%s2042_s3 + $0x10] sm:$0xff] }
 0x10e   : > { %v519_v9 = vpop.f32.mrf.mxu2  ;;  %v548_v10 = vpop.f32.mrf.mxu3 }
 0x10f   : > { %v520_v13 = vadd.f32 %v519_v9, %v1586_v7  ;;  %v549_v14 = vadd.f32 %v548_v10, %v1588_v8  ;;  %v464_v15 = vpop.f32.mrf.mxu0  ;;  %v493_v16 = vpop.f32.mrf.mxu1 }
 0x110   : > { %v465_v24 = vadd.f32 %v464_v15, %v1580_v1  ;;  %v494_v25 = vadd.f32 %v493_v16, %v1582_v3 }
 0x111   : > { %v562_v19 = vmax.f32 %v520_v13, 0.0  ;;  %v563_v20 = vmax.f32 %v549_v14, 0.0 }
 0x112   : > { %v564_v31 = vmax.f32 %v465_v24, 0.0  ;;  %v565_v32 = vmax.f32 %v494_v25, 0.0 }
 0x113   : > { %v580_v23 = vmax.f32 %v562_v19, %v563_v20 }
 0x114   : > { %v577_v41 = vmax.f32 %v564_v31, %v565_v32 }
 0x115   : > { %v584_v27 = vmax.f32 %v576_v22, %v580_v23 }
 0x116   : > { %v522_v29 = vpop.f32.mrf.mxu2  ;;  %v551_v30 = vpop.f32.mrf.mxu3 }
 0x117   : > { %v523_v33 = vadd.f32 %v522_v29, %v1586_v7  ;;  %v552_v34 = vadd.f32 %v551_v30, %v1588_v8  ;;  %592 = vrot.lane.b32.xlu2 %v584_v27, %s1348_s26  ;;  %v467_v35 = vpop.f32.mrf.mxu0  ;;  %v496_v36 = vpop.f32.mrf.mxu1 }
 0x118   : > { %v468_v43 = vadd.f32 %v467_v35, %v1580_v1  ;;  %v497_v44 = vadd.f32 %v496_v36, %v1582_v3 }
 0x119   : > { %v566_v38 = vmax.f32 %v523_v33, 0.0  ;;  %v567_v39 = vmax.f32 %v552_v34, 0.0 }
 0x11a   : > { %v568_v50 = vmax.f32 %v468_v43, 0.0  ;;  %v569_v51 = vmax.f32 %v497_v44, 0.0 }
 0x11b   : > { %v581_v42 = vmax.f32 %v566_v38, %v567_v39 }
 0x11c   : > { %v578_v62 = vmax.f32 %v568_v50, %v569_v51 }
 0x11d   : > { %v585_v46 = vmax.f32 %v577_v41, %v581_v42 }
 0x11e   : > { %v525_v48 = vpop.f32.mrf.mxu2  ;;  %v554_v49 = vpop.f32.mrf.mxu3 }
 0x11f   : > { %v526_v52 = vadd.f32 %v525_v48, %v1586_v7  ;;  %v555_v53 = vadd.f32 %v554_v49, %v1588_v8  ;;  %594 = vrot.lane.b32.xlu2 %v585_v46, %s1348_s26  ;;  %v470_v54 = vpop.f32.mrf.mxu0  ;;  %v499_v55 = vpop.f32.mrf.mxu1 }
 0x120   : > { %v471_v59 = vadd.f32 %v470_v54, %v1580_v1  ;;  %v500_v60 = vadd.f32 %v499_v55, %v1582_v3  ;;  %v784_v1 = vld [vmem:[%s2042_s3 + $0x18] sm:$0xff] }
 0x121   : > { %v570_v57 = vmax.f32 %v526_v52, 0.0  ;;  %v571_v58 = vmax.f32 %v555_v53, 0.0  ;;  %866 = vmatpush.msrb.mxu0 %v784_v1  ;;  %v826_v1 = vld [vmem:[%s2042_s3 + $0x168] sm:$0xff] }
 0x122   : > { %v572_v2 = vmax.f32 %v471_v59, 0.0  ;;  %v573_v4 = vmax.f32 %v500_v60, 0.0 }
 0x123   : > { %v582_v63 = vmax.f32 %v570_v57, %v571_v58  ;;  %867 = vmatpush.msrb.mxu0 %v783_v11  ;;  %v805_v11 = vld [vmem:[%s2042_s3 + $0xc0] sm:$0xff] }
 0x124   : > { %v579_v12 = vmax.f32 %v572_v2, %v573_v4  ;;  %v828_v2 = vld [vmem:[%s2042_s3 + $0x178] sm:$0xff]  ;;  %v809_v4 = vld [vmem:[%s2042_s3 + $0xe0] sm:$0xff] }
 0x125   : > { %v586_v5 = vmax.f32 %v578_v62, %v582_v63  ;;  %v812_v62 = vld [vmem:[%s2042_s3 + $0xf8] sm:$0xff]  ;;  %v811_v63 = vld [vmem:[%s2042_s3 + $0xf0] sm:$0xff]  ;;  %912 = vmatpush.msrb.mxu2 %v828_v2  ;;  %v797_v2 = vld [vmem:[%s2042_s3 + $0x80] sm:$0xff] }
 0x126   : > { %v528_v3 = vpop.f32.mrf.mxu2  ;;  %v557_v6 = vpop.f32.mrf.mxu3  ;;  %883 = vmatpush.msrb.mxu1 %v812_v62  ;;  %v798_v62 = vld [vmem:[%s2042_s3 + $0x88] sm:$0xff] }
 0x127   : > { %v529_v9 = vadd.f32 %v528_v3, %v1586_v7  ;;  %v558_v10 = vadd.f32 %v557_v6, %v1588_v8  ;;  %596 = vrot.lane.b32.xlu0 %v586_v5, %s1348_s26  ;;  %v782_v7 = vld [vmem:[%s2042_s3 + $0x8] sm:$0xff]  ;;  %v781_v8 = vld [vmem:[%s2042_s3] sm:$0xff]  ;;  %v827_v5 = vld [vmem:[%s2042_s3 + $0x170] sm:$0xff] }
 0x128   : > { %868 = vmatpush.msrb.mxu0 %v782_v7  ;;  %884 = vmatpush.msrb.mxu1 %v811_v63  ;;  %v808_v3 = vld [vmem:[%s2042_s3 + $0xd8] sm:$0xff]  ;;  %v825_v6 = vld [vmem:[%s2042_s3 + $0x160] sm:$0xff] }
 0x129   : > { %v574_v13 = vmax.f32 %v529_v9, 0.0  ;;  %v575_v14 = vmax.f32 %v558_v10, 0.0  ;;  %913 = vmatpush.msrb.mxu2 %v827_v5  ;;  %v807_v9 = vld [vmem:[%s2042_s3 + $0xd0] sm:$0xff]  ;;  %v806_v10 = vld [vmem:[%s2042_s3 + $0xc8] sm:$0xff]  ;;  %v824_v63 = vld [vmem:[%s2042_s3 + $0x158] sm:$0xff] }
 0x12a   : > { %869 = vmatpush.msrb.mxu0 %v781_v8  ;;  %885 = vmatpush.msrb.mxu1 %v810_v0  ;;  %v803_v8 = vld [vmem:[%s2042_s3 + $0xb0] sm:$0xff]  ;;  %v840_v0 = vld [vmem:[%s2042_s3 + $0x1d8] sm:$0xff] }
 0x12b   : > { %v583_v15 = vmax.f32 %v574_v13, %v575_v14  ;;  %914 = vmatpush.msrb.mxu2 %v826_v1  ;;  %v804_v13 = vld [vmem:[%s2042_s3 + $0xb8] sm:$0xff]  ;;  %v839_v5 = vld [vmem:[%s2042_s3 + $0x1d0] sm:$0xff]  ;;  %945 = vmatpush.msrb.mxu3 %v840_v0  ;;  %v822_v1 = vld [vmem:[%s2042_s3 + $0x148] sm:$0xff] }
 0x12c   : > { %886 = vmatpush.msrb.mxu1 %v809_v4  ;;  %v823_v4 = vld [vmem:[%s2042_s3 + $0x150] sm:$0xff] }
 0x12d   : > { %v587_v16 = vmax.f32 %v579_v12, %v583_v15  ;;  %915 = vmatpush.msrb.mxu2 %v825_v6  ;;  %946 = vmatpush.msrb.mxu3 %v839_v5  ;;  %v821_v6 = vld [vmem:[%s2042_s3 + $0x140] sm:$0xff] }
 0x12e   : > { %887 = vmatpush.msrb.mxu1 %v808_v3  ;;  %v838_v3 = vld [vmem:[%s2042_s3 + $0x1c8] sm:$0xff] }
 0x12f   : > { %598 = vrot.lane.b32.xlu1 %v587_v16, %s1348_s26  ;;  %s1349_s26 = smov 64   ;;  %916 = vmatpush.msrb.mxu2 %v824_v63 }
 0x130   : > { %888 = vmatpush.msrb.mxu1 %v807_v9  ;;  %v837_v9 = vld [vmem:[%s2042_s3 + $0x1c0] sm:$0xff]  ;;  %947 = vmatpush.msrb.mxu3 %v838_v3 }
 0x131   : > { %917 = vmatpush.msrb.mxu2 %v823_v4 }
 0x132   : > { %889 = vmatpush.msrb.mxu1 %v806_v10  ;;  %948 = vmatpush.msrb.mxu3 %v837_v9  ;;  %v820_v10 = vld [vmem:[%s2042_s3 + $0x138] sm:$0xff] }
 0x133   : > { %918 = vmatpush.msrb.mxu2 %v822_v1 }
 0x134   : > { %890 = vmatpush.msrb.mxu1 %v805_v11  ;;  %v836_v11 = vld [vmem:[%s2042_s3 + $0x1b8] sm:$0xff] }
 0x135   : > { %919 = vmatpush.msrb.mxu2 %v821_v6  ;;  %949 = vmatpush.msrb.mxu3 %v836_v11 }
 0x136   : > { %891 = vmatpush.msrb.mxu1 %v804_v13  ;;  %v835_v13 = vld [vmem:[%s2042_s3 + $0x1b0] sm:$0xff] }
 0x137   : > { %920 = vmatpush.msrb.mxu2 %v820_v10  ;;  %950 = vmatpush.msrb.mxu3 %v835_v13 }
 0x138   : > { %892 = vmatpush.msrb.mxu1 %v803_v8  ;;  %v816_v8 = vld [vmem:[%s2042_s3 + $0x118] sm:$0xff] }
 0x171   : > { %v593_v17 = vpop.permute.xlu2 %592 }
 0x172   : > { %v605_v18 = vsel %vm604_vm3, 0.0, %v593_v17  ;;  %v609_v19 = vsel %vm604_vm3, %v593_v17, 0.0 }
 0x173   : > { %v621_v21 = vrot.slane %v605_v18, 7  ;;  %v622_v22 = vrot.slane %v609_v19, 7 }
 0x175   : > { %v638_v23 = vsel %vm637_vm4, 0.0, %v621_v21  ;;  %v1665_v24 = vsel %vm637_vm4, 0.0, %v622_v22  ;;  %v646_v25 = vsel %vm637_vm4, %v621_v21, 0.0  ;;  %v647_v26 = vsel %vm637_vm4, %v622_v22, 0.0  ;;  %1278 = vmatmul.msk.f32.vlgmr.msrb.gmra.mxu0 %vm1659_vm5, %v621_v21  ;;  %v802_v22 = vld [vmem:[%s2042_s3 + $0xa8] sm:$0xff] }
 0x176   : > { %v670_v27 = vrot.slane %v638_v23, 1  ;;  %v671_v28 = vrot.slane %v646_v25, 1  ;;  %v673_v29 = vrot.slane %v1665_v24, 1  ;;  %v674_v30 = vrot.slane %v647_v26, 1  ;;  %893 = vmatpush.msrb.mxu1 %v802_v22  ;;  %v814_v22 = vld [vmem:[%s2042_s3 + $0x108] sm:$0xff] }
 0x177   : > { %v699_v31 = vrot.slane %v647_v26, 2  ;;  %v698_v32 = vrot.slane %v1665_v24, 2  ;;  %v695_v33 = vrot.slane %v638_v23, 2  ;;  %v696_v34 = vrot.slane %v646_v25, 2 }
 0x178   : > { %v672_v35 = vsel %vm355_vm0, %v670_v27, %v671_v28  ;;  %v675_v36 = vsel %vm355_vm0, %v673_v29, %v674_v30 }
 0x179   : > { %v700_v37 = vsel %vm694_vm6, %v698_v32, %v699_v31  ;;  %v697_v38 = vsel %vm694_vm6, %v695_v33, %v696_v34  ;;  %v595_v39 = vpop.permute.xlu2 %594  ;;  %v1309_v40 = vpack.i.bf16 %v675_v36, %v672_v35  ;;  %v801_v34 = vld [vmem:[%s2042_s3 + $0xa0] sm:$0xff] }
 0x17a   : > { %750 = vrot.lane.b32.xlu1 %v700_v37, %s1349_s26  ;;  %748 = vrot.lane.b32.xlu0 %v697_v38, %s1349_s26  ;;  %v606_v41 = vsel %vm604_vm3, 0.0, %v595_v39  ;;  %v610_v42 = vsel %vm604_vm3, %v595_v39, 0.0 }
 0x17b   : > { %v623_v43 = vrot.slane %v606_v41, 7  ;;  %v624_v44 = vrot.slane %v610_v42, 7  ;;  %1310 = vrot.lane.b32.xlu2 %v1309_v40, %s1350_s14  ;;  %v800_v41 = vld [vmem:[%s2042_s3 + $0x98] sm:$0xff]  ;;  %894 = vmatpush.msrb.mxu1 %v801_v34 }
 0x17d   : > { %v640_v45 = vsel %vm637_vm4, 0.0, %v623_v43  ;;  %v1684_v46 = vsel %vm637_vm4, 0.0, %v624_v44  ;;  %v648_v47 = vsel %vm637_vm4, %v623_v43, 0.0  ;;  %v649_v48 = vsel %vm637_vm4, %v624_v44, 0.0  ;;  %1280 = vmatmul.msk.f32.gmra.mxu0 %vm1659_vm5, %v623_v43  ;;  %v799_v44 = vld [vmem:[%s2042_s3 + $0x90] sm:$0xff]  ;;  %895 = vmatpush.msrb.mxu1 %v800_v41 }
 0x17e   : > { %v676_v49 = vrot.slane %v640_v45, 1  ;;  %v677_v50 = vrot.slane %v648_v47, 1  ;;  %v679_v51 = vrot.slane %v1684_v46, 1  ;;  %v680_v52 = vrot.slane %v649_v48, 1 }
 0x17f   : > { %v705_v53 = vrot.slane %v649_v48, 2  ;;  %v704_v54 = vrot.slane %v1684_v46, 2  ;;  %v701_v55 = vrot.slane %v640_v45, 2  ;;  %v702_v56 = vrot.slane %v648_v47, 2  ;;  %896 = vmatpush.msrb.mxu1 %v799_v44 }
 0x180   : > { %v678_v57 = vsel %vm355_vm0, %v676_v49, %v677_v50  ;;  %v681_v58 = vsel %vm355_vm0, %v679_v51, %v680_v52 }
 0x181   : > { %v706_v59 = vsel %vm694_vm6, %v704_v54, %v705_v53  ;;  %v703_v60 = vsel %vm694_vm6, %v701_v55, %v702_v56  ;;  %v1314_v61 = vpack.i.bf16 %v681_v58, %v678_v57  ;;  %897 = vmatpush.msrb.mxu1 %v798_v62 }
 0x182   : > { %754 = vrot.lane.b32.xlu1 %v706_v59, %s1349_s26  ;;  %752 = vrot.lane.b32.xlu0 %v703_v60, %s1349_s26 }
 0x183   : > { %1315 = vrot.lane.b32.xlu2 %v1314_v61, %s1350_s14  ;;  %898 = vmatpush.msrb.mxu1 %v797_v2 }
 0x199   : > { %v597_v12 = vpop.permute.xlu0 %596 }
 0x19a   : > { %v607_v14 = vsel %vm604_vm3, 0.0, %v597_v12  ;;  %v611_v15 = vsel %vm604_vm3, %v597_v12, 0.0  ;;  %v819_v12 = vld [vmem:[%s2042_s3 + $0x130] sm:$0xff] }
 0x19b   : > { %v625_v16 = vrot.slane %v607_v14, 7  ;;  %v626_v7 = vrot.slane %v611_v15, 7  ;;  %921 = vmatpush.msrb.mxu2 %v819_v12  ;;  %v818_v14 = vld [vmem:[%s2042_s3 + $0x128] sm:$0xff] }
 0x19c   : > { %v834_v15 = vld [vmem:[%s2042_s3 + $0x1a8] sm:$0xff] }
 0x19d   : > { %v642_v17 = vsel %vm637_vm4, 0.0, %v625_v16  ;;  %v1745_v18 = vsel %vm637_vm4, 0.0, %v626_v7  ;;  %v650_v19 = vsel %vm637_vm4, %v625_v16, 0.0  ;;  %v651_v21 = vsel %vm637_vm4, %v626_v7, 0.0  ;;  %1282 = vmatmul.msk.f32.gmra.mxu0 %vm1659_vm5, %v625_v16  ;;  %v817_v16 = vld [vmem:[%s2042_s3 + $0x120] sm:$0xff]  ;;  %922 = vmatpush.msrb.mxu2 %v818_v14 }
 0x19e   : > { %v682_v23 = vrot.slane %v642_v17, 1  ;;  %v683_v25 = vrot.slane %v650_v19, 1  ;;  %v685_v26 = vrot.slane %v1745_v18, 1  ;;  %v686_v27 = vrot.slane %v651_v21, 1  ;;  %v833_v7 = vld [vmem:[%s2042_s3 + $0x1a0] sm:$0xff]  ;;  %951 = vmatpush.msrb.mxu3 %v834_v15 }
 0x19f   : > { %v711_v28 = vrot.slane %v651_v21, 2  ;;  %v710_v29 = vrot.slane %v1745_v18, 2  ;;  %v707_v30 = vrot.slane %v642_v17, 2  ;;  %v708_v31 = vrot.slane %v650_v19, 2  ;;  %923 = vmatpush.msrb.mxu2 %v817_v16  ;;  %v832_v17 = vld [vmem:[%s2042_s3 + $0x198] sm:$0xff]  ;;  %v815_v19 = vld [vmem:[%s2042_s3 + $0x110] sm:$0xff] }
 0x1a0   : > { %v684_v32 = vsel %vm355_vm0, %v682_v23, %v683_v25  ;;  %v687_v33 = vsel %vm355_vm0, %v685_v26, %v686_v27  ;;  %952 = vmatpush.msrb.mxu3 %v833_v7  ;;  %v831_v21 = vld [vmem:[%s2042_s3 + $0x190] sm:$0xff]  ;;  %v830_v23 = vld [vmem:[%s2042_s3 + $0x188] sm:$0xff]  ;;  %v813_v25 = vld [vmem:[%s2042_s3 + $0x100] sm:$0xff] }
 0x1a1   : > { %v599_v35 = vpop.permute.xlu1 %598  ;;  %v712_v36 = vsel %vm694_vm6, %v710_v29, %v711_v28  ;;  %v709_v37 = vsel %vm694_vm6, %v707_v30, %v708_v31  ;;  %v1319_v38 = vpack.i.bf16 %v687_v33, %v684_v32  ;;  %924 = vmatpush.msrb.mxu2 %v816_v8  ;;  %v829_v26 = vld [vmem:[%s2042_s3 + $0x180] sm:$0xff] }
 0x1a2   : > { %v608_v39 = vsel %vm604_vm3, 0.0, %v599_v35  ;;  %v612_v40 = vsel %vm604_vm3, %v599_v35, 0.0  ;;  %758 = vrot.lane.b32.xlu1 %v712_v36, %s1349_s26  ;;  %756 = vrot.lane.b32.xlu0 %v709_v37, %s1349_s26 }
 0x1a3   : > { %v627_v42 = vrot.slane %v608_v39, 7  ;;  %v628_v43 = vrot.slane %v612_v40, 7  ;;  %1320 = vrot.lane.b32.xlu2 %v1319_v38, %s1350_s14  ;;  %953 = vmatpush.msrb.mxu3 %v832_v17 }
 0x1a4   : > { %925 = vmatpush.msrb.mxu2 %v815_v19 }
 0x1a5   : > { %v644_v45 = vsel %vm637_vm4, 0.0, %v627_v42  ;;  %v1776_v47 = vsel %vm637_vm4, 0.0, %v628_v43  ;;  %v652_v48 = vsel %vm637_vm4, %v627_v42, 0.0  ;;  %v653_v49 = vsel %vm637_vm4, %v628_v43, 0.0  ;;  %1284 = vmatmul.msk.f32.gmra.mxu0 %vm1659_vm5, %v627_v42  ;;  %954 = vmatpush.msrb.mxu3 %v831_v21 }
 0x1a6   : > { %v688_v50 = vrot.slane %v644_v45, 1  ;;  %v689_v51 = vrot.slane %v652_v48, 1  ;;  %v691_v52 = vrot.slane %v1776_v47, 1  ;;  %v692_v53 = vrot.slane %v653_v49, 1  ;;  %926 = vmatpush.msrb.mxu2 %v814_v22 }
 0x1a7   : > { %v717_v54 = vrot.slane %v653_v49, 2  ;;  %v713_v55 = vrot.slane %v644_v45, 2  ;;  %v714_v56 = vrot.slane %v652_v48, 2  ;;  %v716_v57 = vrot.slane %v1776_v47, 2  ;;  %955 = vmatpush.msrb.mxu3 %v830_v23 }
 0x1a8   : > { %v690_v58 = vsel %vm355_vm0, %v688_v50, %v689_v51  ;;  %v693_v59 = vsel %vm355_vm0, %v691_v52, %v692_v53  ;;  %927 = vmatpush.msrb.mxu2 %v813_v25 }
 0x1a9   : > { %v715_v60 = vsel %vm694_vm6, %v713_v55, %v714_v56  ;;  %v718_v20 = vsel %vm694_vm6, %v716_v57, %v717_v54  ;;  %v1324_v61 = vpack.i.bf16 %v693_v59, %v690_v58  ;;  %956 = vmatpush.msrb.mxu3 %v829_v26 }
 0x1aa   : > { %760 = vrot.lane.b32.xlu0 %v715_v60, %s1349_s26  ;;  %762 = vrot.lane.b32.xlu1 %v718_v20, %s1349_s26 }
 0x1ab   : > { %1325 = vrot.lane.b32.xlu2 %v1324_v61, %s1350_s14  ;;  %v1329_v61 = vld [vmem:[%s2043_s4] ss:$0 sm:$0xff] }
 0x1d5   : > { %v1311_v27 = vpop.permute.xlu2 %1310 }
 0x1d6   : > { %v1312_v28 = vunpack.i.l.bf16 %v1311_v27  ;;  %v1313_v33 = vunpack.i.h.bf16 %v1311_v27 }
 0x1d8   : > { %v773_v29 = vsel %vm735_vm7, %v1665_v24, %v1312_v28  ;;  %v736_v36 = vsel %vm735_vm7, %v1312_v28, %v1313_v33 }
 0x1d9   : > { %899 = vmatmul.f32.vlgmr.msrb.gmra.mxu1 %v773_v29 }
 0x1dd   : > { %v1316_v30 = vpop.permute.xlu2 %1315 }
 0x1de   : > { %v1317_v31 = vunpack.i.l.bf16 %v1316_v30  ;;  %v1318_v24 = vunpack.i.h.bf16 %v1316_v30 }
 0x1e0   : > { %v774_v32 = vsel %vm735_vm7, %v1684_v46, %v1317_v31  ;;  %v737_v46 = vsel %vm735_vm7, %v1317_v31, %v1318_v24  ;;  %v1010_v24 = vld [vmem:[%s2044_s5 + $0x18] sm:$0xff] }
 0x1e1   : > { %902 = vmatmul.f32.gmra.mxu1 %v774_v32 }
 0x1e2   : > { %1060 = vmatpush.msra.mxu1 %v1010_v24 }
 0x1ec   : > { %v751_v34 = vpop.permute.xlu1 %750  ;;  %v749_v35 = vpop.permute.xlu0 %748 }
 0x1ed   : > { %v765_v37 = vsel %vm764_vm8, %v749_v35, %v751_v34  ;;  %v777_v38 = vsel %vm764_vm8, %v736_v36, %v749_v35 }
 0x1ee   : > { %928 = vmatmul.f32.vlgmr.msrb.gmra.mxu2 %v777_v38  ;;  %1285 = vmatmul.msk.f32.vlgmr.msrb.gmra.mxu3 %vm845_vm9, %v765_v37  ;;  %v1009_v38 = vld [vmem:[%s2044_s5 + $0x10] sm:$0xff] }
 0x1ef   : > { %1037 = vmatpush.msra.mxu0 %v1009_v38 }
 0x1f2   : > { %v871_v20 = vpop.f32.mrf.mxu0 }
 0x1f3   : > { %v872_v63 = vadd.f32 %v1329_v61, %v871_v20  ;;  %v1081_v20 = vld [vmem:[%s2046_s7 + $0x40] sm:$0xff] }
 0x1f4   : > { %v755_v39 = vpop.permute.xlu1 %754  ;;  %v753_v40 = vpop.permute.xlu0 %752 }
 0x1f5   : > { %v778_v41 = vsel %vm764_vm8, %v737_v46, %v753_v40  ;;  %v766_v42 = vsel %vm764_vm8, %v753_v40, %v755_v39  ;;  %v1007_v39 = vld [vmem:[%s2044_s5] sm:$0xff]  ;;  %v1008_v40 = vld [vmem:[%s2044_s5 + $0x8] sm:$0xff] }
 0x1f6   : > { %931 = vmatmul.f32.gmra.mxu2 %v778_v41  ;;  %1286 = vmatmul.msk.f32.gmra.mxu3 %vm845_vm9, %v766_v42 }
 0x1f7   : > { %1038 = vmatpush.msra.mxu0 %v1007_v39  ;;  %1061 = vmatpush.msra.mxu1 %v1008_v40 }
 0x1fa   : > { %v874_v1 = vpop.f32.mrf.mxu0 }
 0x1fb   : > { %v875_v9 = vadd.f32 %v1329_v61, %v874_v1 }
 0x1fd   : > { %v1321_v43 = vpop.permute.xlu2 %1320 }
 0x1fe   : > { %v1322_v44 = vunpack.i.l.bf16 %v1321_v43  ;;  %v1323_v51 = vunpack.i.h.bf16 %v1321_v43 }
 0x200   : > { %v775_v45 = vsel %vm735_vm7, %v1745_v18, %v1322_v44  ;;  %v738_v54 = vsel %vm735_vm7, %v1322_v44, %v1323_v51  ;;  %v1086_v51 = vld [vmem:[%s2046_s7 + $0x68] sm:$0xff] }
 0x201   : > { %905 = vmatmul.f32.gmra.mxu1 %v775_v45  ;;  %v1088_v45 = vld [vmem:[%s2046_s7 + $0x78] sm:$0xff] }
 0x202   : > { %1109 = vmatpush.msra.mxu2 %v1088_v45 }
 0x205   : > { %v1326_v48 = vpop.permute.xlu2 %1325 }
 0x206   : > { %v1327_v49 = vunpack.i.l.bf16 %v1326_v48  ;;  %v1328_v18 = vunpack.i.h.bf16 %v1326_v48  ;;  %v1104_v48 = vld [vmem:[%s2046_s7 + $0xf8] sm:$0xff] }
 0x207   : > { %1132 = vmatpush.msra.mxu3 %v1104_v48 }
 0x208   : > { %v776_v50 = vsel %vm735_vm7, %v1776_v47, %v1327_v49  ;;  %v739_v59 = vsel %vm735_vm7, %v1327_v49, %v1328_v18  ;;  %v1087_v49 = vld [vmem:[%s2046_s7 + $0x70] sm:$0xff]  ;;  %v1084_v18 = vld [vmem:[%s2046_s7 + $0x58] sm:$0xff] }
 0x209   : > { %908 = vmatmul.f32.gmra.mxu1 %v776_v50  ;;  %v1103_v50 = vld [vmem:[%s2046_s7 + $0xf0] sm:$0xff]  ;;  %1110 = vmatpush.msra.mxu2 %v1087_v49 }
 0x20a   : > { %1133 = vmatpush.msra.mxu3 %v1103_v50 }
 0x20b   : > { %1111 = vmatpush.msra.mxu2 %v1086_v51 }
 0x214   : > { %v759_v52 = vpop.permute.xlu1 %758  ;;  %v757_v53 = vpop.permute.xlu0 %756 }
 0x215   : > { %v779_v55 = vsel %vm764_vm8, %v738_v54, %v757_v53  ;;  %v767_v56 = vsel %vm764_vm8, %v757_v53, %v759_v52  ;;  %v1102_v52 = vld [vmem:[%s2046_s7 + $0xe8] sm:$0xff] }
 0x216   : > { %934 = vmatmul.f32.gmra.mxu2 %v779_v55  ;;  %1287 = vmatmul.msk.f32.gmra.mxu3 %vm845_vm9, %v767_v56  ;;  %v1085_v55 = vld [vmem:[%s2046_s7 + $0x60] sm:$0xff] }
 0x217   : > { %v1101_v56 = vld [vmem:[%s2046_s7 + $0xe0] sm:$0xff]  ;;  %1134 = vmatpush.msra.mxu3 %v1102_v52  ;;  %1112 = vmatpush.msra.mxu2 %v1085_v55 }
 0x219   : > { %1135 = vmatpush.msra.mxu3 %v1101_v56  ;;  %1113 = vmatpush.msra.mxu2 %v1084_v18 }
 0x21a   : > { %v877_v7 = vpop.f32.mrf.mxu0 }
 0x21b   : > { %v878_v17 = vadd.f32 %v1329_v61, %v877_v7  ;;  %v1074_v7 = vld [vmem:[%s2046_s7 + $0x8] sm:$0xff] }
 0x21c   : > { %v761_v57 = vpop.permute.xlu0 %760  ;;  %v763_v58 = vpop.permute.xlu1 %762 }
 0x21d   : > { %v780_v47 = vsel %vm764_vm8, %v739_v59, %v761_v57  ;;  %v768_v60 = vsel %vm764_vm8, %v761_v57, %v763_v58  ;;  %v1100_v57 = vld [vmem:[%s2046_s7 + $0xd8] sm:$0xff]  ;;  %v1083_v58 = vld [vmem:[%s2046_s7 + $0x50] sm:$0xff] }
 0x21e   : > { %937 = vmatmul.f32.gmra.mxu2 %v780_v47  ;;  %1288 = vmatmul.msk.f32.gmra.mxu3 %vm845_vm9, %v768_v60  ;;  %v1099_v59 = vld [vmem:[%s2046_s7 + $0xd0] sm:$0xff]  ;;  %v1082_v47 = vld [vmem:[%s2046_s7 + $0x48] sm:$0xff] }
 0x21f   : > { %1136 = vmatpush.msra.mxu3 %v1100_v57  ;;  %v1098_v60 = vld [vmem:[%s2046_s7 + $0xc8] sm:$0xff]  ;;  %1114 = vmatpush.msra.mxu2 %v1083_v58 }
 0x221   : > { %1137 = vmatpush.msra.mxu3 %v1099_v59  ;;  %1115 = vmatpush.msra.mxu2 %v1082_v47 }
 0x222   : > { %v880_v25 = vpop.f32.mrf.mxu0 }
 0x223   : > { %v881_v28 = vadd.f32 %v1329_v61, %v880_v25  ;;  %v1097_v61 = vld [vmem:[%s2046_s7 + $0xc0] sm:$0xff]  ;;  %1138 = vmatpush.msra.mxu3 %v1098_v60  ;;  %1116 = vmatpush.msra.mxu2 %v1081_v20 }
 0x225   : > { %1139 = vmatpush.msra.mxu3 %v1097_v61 }
 0x256   : > { %v900_v62 = vpop.f32.mrf.mxu1 }
 0x257   : > { %v901_v0 = vadd.f32 %v900_v62, %v872_v63  ;;  %v1080_v62 = vld [vmem:[%s2046_s7 + $0x38] sm:$0xff] }
 0x258   : > { %v1096_v63 = vld [vmem:[%s2046_s7 + $0xb8] sm:$0xff]  ;;  %1117 = vmatpush.msra.mxu2 %v1080_v62 }
 0x259   : > { %1140 = vmatpush.msra.mxu3 %v1096_v63 }
 0x25e   : > { %v903_v6 = vpop.f32.mrf.mxu1 }
 0x25f   : > { %v904_v11 = vadd.f32 %v903_v6, %v875_v9  ;;  %v1077_v6 = vld [vmem:[%s2046_s7 + $0x20] sm:$0xff] }
 0x260   : > { %v1093_v9 = vld [vmem:[%s2046_s7 + $0xa0] sm:$0xff] }
 0x271   : > { %v929_v2 = vpop.f32.mrf.mxu2  ;;  %v958_v4 = vpop.f32.mrf.mxu3 }
 0x272   : > { %v930_v5 = vadd.f32 %v929_v2, %v901_v0  ;;  %v1079_v0 = vld [vmem:[%s2046_s7 + $0x30] sm:$0xff] }
 0x273   : > { %v1095_v2 = vld [vmem:[%s2046_s7 + $0xb0] sm:$0xff]  ;;  %1118 = vmatpush.msra.mxu2 %v1079_v0 }
 0x274   : > { %v959_v3 = vadd.f32 %v958_v4, %v930_v5  ;;  %v1078_v4 = vld [vmem:[%s2046_s7 + $0x28] sm:$0xff]  ;;  %1141 = vmatpush.msra.mxu3 %v1095_v2 }
 0x275   : > { %v1094_v5 = vld [vmem:[%s2046_s7 + $0xa8] sm:$0xff]  ;;  %1119 = vmatpush.msra.mxu2 %v1078_v4 }
 0x276   : > { %v970_v10 = vmax.f32 %v959_v3, 0.0  ;;  %1142 = vmatpush.msra.mxu3 %v1094_v5 }
 0x277   : > { %1120 = vmatpush.msra.mxu2 %v1077_v6 }
 0x278   : > { %978 = vrot.lane.b32.xlu2 %v970_v10, %s1351_s13  ;;  %1143 = vmatpush.msra.mxu3 %v1093_v9 }
 0x279   : > { %v932_v12 = vpop.f32.mrf.mxu2  ;;  %v961_v14 = vpop.f32.mrf.mxu3 }
 0x27a   : > { %v933_v13 = vadd.f32 %v932_v12, %v904_v11  ;;  %v1092_v11 = vld [vmem:[%s2046_s7 + $0x98] sm:$0xff] }
 0x27b   : > { %1144 = vmatpush.msra.mxu3 %v1092_v11 }
 0x27c   : > { %v962_v15 = vadd.f32 %v961_v14, %v933_v13 }
 0x27e   : > { %v971_v16 = vmax.f32 %v962_v15, 0.0  ;;  %v906_v8 = vpop.f32.mrf.mxu1  ;;  %v1075_v15 = vld [vmem:[%s2046_s7 + $0x10] sm:$0xff] }
 0x27f   : > { %v907_v19 = vadd.f32 %v906_v8, %v878_v17  ;;  %v1090_v8 = vld [vmem:[%s2046_s7 + $0x88] sm:$0xff]  ;;  %v1073_v17 = vld [vmem:[%s2046_s7] sm:$0xff] }
 0x280   : > { %980 = vrot.lane.b32.xlu0 %v971_v16, %s1351_s13 }
 0x286   : > { %v909_v27 = vpop.f32.mrf.mxu1 }
 0x287   : > { %v910_v30 = vadd.f32 %v909_v27, %v881_v28 }
 0x299   : > { %v935_v21 = vpop.f32.mrf.mxu2  ;;  %v964_v22 = vpop.f32.mrf.mxu3 }
 0x29a   : > { %v936_v23 = vadd.f32 %v935_v21, %v907_v19  ;;  %v1089_v19 = vld [vmem:[%s2046_s7 + $0x80] sm:$0xff] }
 0x29b   : > { %v1011_v21 = vld [vmem:[%s2045_s6] sm:$0x3] }
 0x29c   : > { %v1896_v26 = vadd.f32 %v964_v22, %v936_v23  ;;  %v1013_v22 = vperm.slane %v1011_v21, 0  ;;  %v1014_v23 = vperm.slane %v1011_v21, 1 }
 0x29e   : > { %v972_v29 = vmax.f32 %v1896_v26, 0.0 }
 0x2a0   : > { %982 = vrot.lane.b32.xlu1 %v972_v29, %s1351_s13 }
 0x2a1   : > { %v938_v31 = vpop.f32.mrf.mxu2  ;;  %v967_v32 = vpop.f32.mrf.mxu3 }
 0x2a2   : > { %v939_v33 = vadd.f32 %v938_v31, %v910_v30 }
 0x2a4   : > { %v968_v34 = vadd.f32 %v967_v32, %v939_v33 }
 0x2a6   : > { %v973_v35 = vmax.f32 %v968_v34, 0.0 }
 0x2a8   : > { %984 = vrot.lane.b32.xlu2 %v973_v35, %s1351_s13 }
 0x2d2   : > { %v979_v36 = vpop.permute.xlu2 %978 }
 0x2d3   : > { %v990_v37 = vmax.f32 %v970_v10, %v979_v36  ;;  %v1076_v10 = vld [vmem:[%s2046_s7 + $0x18] sm:$0xff] }
 0x2d4   : > { %1121 = vmatpush.msra.mxu2 %v1076_v10 }
 0x2d5   : > { %994 = vst.msk [vmem:[#allocation2] sm:$0xff] %vm604_vm3, %v990_v37  ;;  %v1330_v37 = vld [vmem:[%s2047_s8] ss:$0 sm:$0xff] }
 0x2d6   : > { %1122 = vmatpush.msra.mxu2 %v1075_v15 }
 0x2d8   : > { %1123 = vmatpush.msra.mxu2 %v1074_v7 }
 0x2da   : > { %1124 = vmatpush.msra.mxu2 %v1073_v17 }
 0x2f2   : > { %v981_v46 = vpop.permute.xlu0 %980 }
 0x2f3   : > { %v991_v41 = vmax.f32 %v971_v16, %v981_v46  ;;  %v1091_v16 = vld [vmem:[%s2046_s7 + $0x90] sm:$0xff] }
 0x2f4   : > { %1145 = vmatpush.msra.mxu3 %v1091_v16 }
 0x2f5   : > { %995 = vst.msk [vmem:[#allocation2 + $0x8] sm:$0xff] %vm604_vm3, %v991_v41 }
 0x2f6   : > { %1146 = vmatpush.msra.mxu3 %v1090_v8 }
 0x2f8   : > { %1147 = vmatpush.msra.mxu3 %v1089_v19 }
 0x2fc   : > { %v998_v42 = vld [vmem:[#allocation2] ss:$2 sm:$0xff]  ;;  %v1002_v43 = vld [vmem:[#allocation2 + $0x1] ss:$2 sm:$0xff] }
 0x2fd   : > { %v1005_v44 = vmax.f32 %v998_v42, %v1002_v43 }
 0x2ff   : > { %1289 = vmatmul.msk.f32.vlgmr.msra.gmra.mxu0 %vm604_vm3, %v1005_v44  ;;  %1291 = vmatmul.msk.f32.vlgmr.msra.gmra.mxu1 %vm604_vm3, %v1005_v44 }
 0x302   : > { %v985_v53 = vpop.permute.xlu2 %984 }
 0x303   : > { %v993_v54 = vmax.f32 %v973_v35, %v985_v53 }
 0x305   : > { %997 = vst.msk [vmem:[#allocation2 + $0x18] sm:$0xff] %vm604_vm3, %v993_v54 }
 0x312   : > { %v983_v1 = vpop.permute.xlu1 %982 }
 0x313   : > { %v992_v3 = vmax.f32 %v972_v29, %v983_v1 }
 0x315   : > { %996 = vst.msk [vmem:[#allocation2 + $0x10] sm:$0xff] %vm604_vm3, %v992_v3 }
 0x31c   : > { %v1000_v12 = vld [vmem:[#allocation2 + $0x10] ss:$2 sm:$0xff]  ;;  %v1004_v13 = vld [vmem:[#allocation2 + $0x11] ss:$2 sm:$0xff] }
 0x31d   : > { %v1006_v14 = vmax.f32 %v1000_v12, %v1004_v13 }
 0x31f   : > { %1290 = vmatmul.msk.f32.gmra.mxu0 %vm604_vm3, %v1006_v14  ;;  %1292 = vmatmul.msk.f32.gmra.mxu1 %vm604_vm3, %v1006_v14 }
 0x37c   : > { %v1040_v25 = vpop.f32.mrf.mxu0  ;;  %v1063_v26 = vpop.f32.mrf.mxu1 }
 0x37d   : > { %v1041_v27 = vadd.f32 %v1040_v25, %v1013_v22  ;;  %v1064_v28 = vadd.f32 %v1063_v26, %v1014_v23 }
 0x37f   : > { %v1069_v29 = vmax.f32 %v1041_v27, 0.0  ;;  %v1070_v30 = vmax.f32 %v1064_v28, 0.0 }
 0x381   : > { %1125 = vmatmul.f32.vlgmr.msra.gmra.mxu2 %v1069_v29  ;;  %1148 = vmatmul.f32.vlgmr.msra.gmra.mxu3 %v1070_v30 }
 0x39c   : > { %v1043_v31 = vpop.f32.mrf.mxu0  ;;  %v1066_v32 = vpop.f32.mrf.mxu1 }
 0x39d   : > { %v1044_v33 = vadd.f32 %v1043_v31, %v1013_v22  ;;  %v1067_v34 = vadd.f32 %v1066_v32, %v1014_v23 }
 0x39f   : > { %v1071_v35 = vmax.f32 %v1044_v33, 0.0  ;;  %v1072_v36 = vmax.f32 %v1067_v34, 0.0 }
 0x3a1   : > { %1128 = vmatmul.f32.gmra.mxu2 %v1071_v35  ;;  %1151 = vmatmul.f32.gmra.mxu3 %v1072_v36 }
 0x404   : > { %v1126_v38 = vpop.f32.mrf.mxu2  ;;  %v1149_v39 = vpop.f32.mrf.mxu3 }
 0x405   : > { %v1127_v24 = vadd.f32 %v1330_v37, %v1126_v38 }
 0x407   : > { %v1150_v40 = vadd.f32 %v1149_v39, %v1127_v24 }
 0x409   : > { %v1155_v46 = vsub.f32 0.0, %v1150_v40 }
 0x40b   : > { %v1157_v41 = vmul.f32 1.442695, %v1155_v46 }
 0x40d   : > { %1331 = vpow2.f32 %v1157_v41 }
 0x413   : > { %v1332_v42 = vpop.eup %1331 }
 0x414   : > { %v1161_v43 = vadd.f32 1.0, %v1332_v42 }
 0x416   : > { %1333 = vrcp.f32 %v1161_v43  ;;  %v1174_v49 = vand.u32 2147483648, %v1161_v43  ;;  %v1172_v51 = vand.u32 2147483647, %v1161_v43  ;;  %vm1168_vm11 = vweird.f32 %v1161_v43 }
 0x418   : > { %v1175_v53 = vor.u32 1.1754944e-38, %v1174_v49  ;;  %vm1173_vm13 = vcmp.eq.f32.partialorder %v1172_v51, 8.507059e+37 }
 0x41c   : > { %v1334_v44 = vpop.eup %1333 }
 0x41d   : > { %v1164_v45 = vmul.f32 %v1334_v44, %v1161_v43  ;;  %vm1169_vm10 = vweird.f32 %v1334_v44 }
 0x41e   : > { %vm1170_vm12 = vmor %vm1168_vm11, %vm1169_vm10 }
 0x41f   : > { %v1165_v48 = vsub.f32 1.0, %v1164_v45 }
 0x421   : > { %v1166_v50 = vmul.f32 %v1334_v44, %v1165_v48 }
 0x423   : > { %v1167_v52 = vadd.f32 %v1334_v44, %v1166_v50 }
 0x424   : > { %v1129_v54 = vpop.f32.mrf.mxu2  ;;  %v1152_v57 = vpop.f32.mrf.mxu3 }
 0x425   : > { %v1171_v55 = vsel %vm1170_vm12, %v1334_v44, %v1167_v52  ;;  %v1130_v56 = vadd.f32 %v1330_v37, %v1129_v54 }
 0x426   : > { %v1176_v18 = vsel %vm1173_vm13, %v1175_v53, %v1171_v55 }
 0x427   : > { %1193 = vst.msk [vmem:[%s2030_s17] sm:$0xff] %vm764_vm8, %v1176_v18  ;;  %v1153_v58 = vadd.f32 %v1152_v57, %v1130_v56 }
 0x429   : > { %v1156_v59 = vsub.f32 0.0, %v1153_v58 }
 0x42b   : > { %v1159_v47 = vmul.f32 1.442695, %v1156_v59 }
 0x42d   : > { %1335 = vpow2.f32 %v1159_v47 }
 0x433   : > { %v1336_v60 = vpop.eup %1335 }
 0x434   : > { %v1162_v20 = vadd.f32 1.0, %v1336_v60 }
 0x436   : > { %1337 = vrcp.f32 %v1162_v20  ;;  %v1189_v0 = vand.u32 2147483648, %v1162_v20  ;;  %v1187_v4 = vand.u32 2147483647, %v1162_v20  ;;  %vm1183_vm15 = vweird.f32 %v1162_v20 }
 0x438   : > { %v1190_v1 = vor.u32 1.1754944e-38, %v1189_v0  ;;  %vm1188_vm1 = vcmp.eq.f32.partialorder %v1187_v4, 8.507059e+37 }
 0x43c   : > { %v1338_v61 = vpop.eup %1337 }
 0x43d   : > { %v1179_v62 = vmul.f32 %v1338_v61, %v1162_v20  ;;  %vm1184_vm14 = vweird.f32 %v1338_v61 }
 0x43e   : > { %vm1185_vm0 = vmor %vm1183_vm15, %vm1184_vm14 }
 0x43f   : > { %v1180_v63 = vsub.f32 1.0, %v1179_v62 }
 0x441   : > { %v1181_v2 = vmul.f32 %v1338_v61, %v1180_v63 }
 0x443   : > { %v1182_v5 = vadd.f32 %v1338_v61, %v1181_v2 }
 0x445   : > { %v1186_v3 = vsel %vm1185_vm0, %v1338_v61, %v1182_v5 }
 0x446   : > { %v1191_v6 = vsel %vm1188_vm1, %v1190_v1, %v1186_v3 }
 0x447   : > { %1194 = vst.msk [vmem:[%s2030_s17 + $0x8] sm:$0xff] %vm764_vm8, %v1191_v6 }
 0x448 PF: > { %s19_s30 = sadd.s32 1, %s1345_s30  }
 0x449   : > { %p16_p5 = scmp.ge.s32.totalorder %s19_s30, 4  }
 0x44b   :  { %18 = sbr.rel (!%p16_p5) target bundleno = 1 (0x1), region = 89 }

</bundles_post_ra>
